<compile_context>
chip_gen: v7x
topology: tpu7x:2x2x1
jax: 0.10.0
libtpu: 0.0.40
codegen_flags: <defaults>
</compile_context>

<pallas_src>
from functools import partial

import jax
import jax.numpy as jnp
from jax import lax
from jax.experimental import pallas as pl
from jax.experimental.pallas import tpu as pltpu

# ----------------------------- configuration -------------------------------
IMG = 16
PATCH = 8
CH = 3
DIM = 32
HEADS = 4
HEAD_DIM = DIM // HEADS
MLP_DIM = 64
LAYERS = 2
NUM_CLASSES = 10
NPAD = 128                       # lane-dense padded head width (>= 128 lanes)
LN_EPS = 1e-6                    # torchvision ViT uses eps=1e-6
ATTN_SCALE = 1.0 / float(HEAD_DIM) ** 0.5


# --------------------------- in-kernel helpers ------------------------------
def _ln(x, g, b):
    mu = jnp.mean(x, axis=-1, keepdims=True)
    var = jnp.mean(jnp.square(x - mu), axis=-1, keepdims=True)
    return (x - mu) * lax.rsqrt(var + LN_EPS) * g + b


def _gelu(x):
    # exact (erf-based) GELU, matching torch.nn.GELU() default
    return 0.5 * x * (1.0 + lax.erf(x * 0.7071067811865476))


# ------------------------------ fused kernel --------------------------------
def _vit_fused_kernel(
    # inputs
    patches_ref, conv_w_ref, conv_b_ref, cls_ref, pos_ref,
    ln1_g_ref, ln1_b_ref, wqkv_ref, bqkv_ref, wout_ref, bout_ref,
    ln2_g_ref, ln2_b_ref, wm1_ref, bm1_ref, wm2_ref, bm2_ref,
    lnf_g_ref, lnf_b_ref, head_w_ref, head_b_ref,
    # output
    logits_ref,
    # scratch (persist across the layer grid)
    x_scr, qkv_scr, attn_scr,
    *, batch, seq, n_patch,
):
    layer = pl.program_id(0)

    # ---- grid step 0: patch embedding + class token + positional embedding --
    @pl.when(layer == 0)
    def _embed():
        emb = (jnp.dot(patches_ref[...], conv_w_ref[...],
                       preferred_element_type=jnp.float32) + conv_b_ref[...])
        for b in range(batch):
            x_scr[b * seq: b * seq + 1, :] = cls_ref[...] + pos_ref[0:1, :]
            x_scr[b * seq + 1: (b + 1) * seq, :] = (
                emb[b * n_patch: (b + 1) * n_patch, :] + pos_ref[1:seq, :])

    x = x_scr[...]                                    # (B*S, D) resident activation

    # ---- self-attention sublayer (pre-LN); all batches & heads in one body --
    y = _ln(x, ln1_g_ref[0], ln1_b_ref[0])
    qkv_scr[...] = (jnp.dot(y, wqkv_ref[0], preferred_element_type=jnp.float32)
                    + bqkv_ref[0])                    # (B*S, 3D)
    for b in range(batch):
        r0 = b * seq
        for h in range(HEADS):
            off = h * HEAD_DIM
            q = qkv_scr[r0: r0 + seq, off: off + HEAD_DIM]                    # (S, Dh)
            k = qkv_scr[r0: r0 + seq, DIM + off: DIM + off + HEAD_DIM]        # (S, Dh)
            v = qkv_scr[r0: r0 + seq, 2 * DIM + off: 2 * DIM + off + HEAD_DIM]
            # scores = q @ k^T (contract last dims; tiny per-head XLU cost)
            s = lax.dot_general(q, k, (((1,), (1,)), ((), ())),
                                preferred_element_type=jnp.float32) * ATTN_SCALE
            m = jnp.max(s, axis=-1, keepdims=True)
            p = jnp.exp(s - m)
            p = p * pl.reciprocal(jnp.sum(p, axis=-1, keepdims=True), approx=True)
            attn_scr[r0: r0 + seq, off: off + HEAD_DIM] = jnp.dot(
                p, v, preferred_element_type=jnp.float32)
    attn_out = (jnp.dot(attn_scr[...], wout_ref[0],
                        preferred_element_type=jnp.float32) + bout_ref[0])
    x = x + attn_out                                  # dropout=0.0 -> identity

    # ---- MLP sublayer (pre-LN) ----------------------------------------------
    z = _ln(x, ln2_g_ref[0], ln2_b_ref[0])
    h1 = jnp.dot(z, wm1_ref[0], preferred_element_type=jnp.float32) + bm1_ref[0]
    h1 = _gelu(h1)
    h2 = jnp.dot(h1, wm2_ref[0], preferred_element_type=jnp.float32) + bm2_ref[0]
    x = x + h2
    x_scr[...] = x

    # ---- last grid step: final LN + classification head (lane-dense store) --
    @pl.when(layer == LAYERS - 1)
    def _head():
        xf = _ln(x, lnf_g_ref[...], lnf_b_ref[...])
        # Head applied to all rows (trivial extra FLOPs); wrapper picks the
        # class-token row and slices the 10 real classes from the 128 lanes.
        logits_ref[...] = (jnp.dot(xf, head_w_ref[...],
                                   preferred_element_type=jnp.float32)
                           + head_b_ref[...])


# ------------------------------ parameters ----------------------------------
def init_params(key):
    ks = iter(jax.random.split(key, 32))
    std = 0.02

    def rnd(shape):
        return (std * jax.random.normal(next(ks), shape)).astype(jnp.float32)

    zeros = lambda s: jnp.zeros(s, jnp.float32)
    ones = lambda s: jnp.ones(s, jnp.float32)

    n_patches = (IMG // PATCH) ** 2
    seq = n_patches + 1
    cpp = CH * PATCH * PATCH

    head_w = jnp.zeros((DIM, NPAD), jnp.float32)
    head_w = head_w.at[:, :NUM_CLASSES].set(rnd((DIM, NUM_CLASSES)))

    return {
        # all weights stored pre-transposed as (K, N): no .T in the forward
        "conv_w": rnd((cpp, DIM)),          # Conv2d(3, D, p, stride=p) flattened
        "conv_b": zeros((1, DIM)),
        "cls": rnd((1, DIM)),               # class token
        "pos": rnd((seq, DIM)),             # positional embedding
        # per-encoder-layer weights, stacked on a leading layer axis
        "ln1_g": ones((LAYERS, 1, DIM)),
        "ln1_b": zeros((LAYERS, 1, DIM)),
        "wqkv": rnd((LAYERS, DIM, 3 * DIM)),   # MHA in_proj (Wq|Wk|Wv), (K,N)
        "bqkv": zeros((LAYERS, 1, 3 * DIM)),
        "wout": rnd((LAYERS, DIM, DIM)),       # MHA out_proj
        "bout": zeros((LAYERS, 1, DIM)),
        "ln2_g": ones((LAYERS, 1, DIM)),
        "ln2_b": zeros((LAYERS, 1, DIM)),
        "wm1": rnd((LAYERS, DIM, MLP_DIM)),
        "bm1": zeros((LAYERS, 1, MLP_DIM)),
        "wm2": rnd((LAYERS, MLP_DIM, DIM)),
        "bm2": zeros((LAYERS, 1, DIM)),
        "lnf_g": ones((1, DIM)),
        "lnf_b": zeros((1, DIM)),
        # replaced heads: Linear(D, num_classes), padded to 128 lanes
        "head_w": head_w,
        "head_b": zeros((1, NPAD)),
    }


# ------------------------------ forward pass ---------------------------------
def vit_forward(params, x):
    """x: (B, C, H, W) float32 NCHW -> logits (B, NUM_CLASSES)."""
    B, C, H, W = x.shape
    p = PATCH
    nh, nw = H // p, W // p
    n = nh * nw
    S = n + 1

    # TODO(synk): at 224x224 scale fold this patchify into the kernel via a
    # BlockSpec index_map gather; at 16x16 the XLA transpose is negligible.
    patches = (
        x.reshape(B, C, nh, p, nw, p)
        .transpose(0, 2, 4, 1, 3, 5)          # (B, nh, nw, C, p, p)
        .reshape(B * n, C * p * p)
    )

    def full2d(arr):
        return pl.BlockSpec(arr.shape, lambda l: (0, 0))

    def per_layer(arr):
        return pl.BlockSpec((1,) + arr.shape[1:], lambda l: (l, 0, 0))

    args = (
        patches,
        params["conv_w"], params["conv_b"], params["cls"], params["pos"],
        params["ln1_g"], params["ln1_b"],
        params["wqkv"], params["bqkv"], params["wout"], params["bout"],
        params["ln2_g"], params["ln2_b"],
        params["wm1"], params["bm1"], params["wm2"], params["bm2"],
        params["lnf_g"], params["lnf_b"],
        params["head_w"], params["head_b"],
    )
    in_specs = [
        full2d(patches),
        full2d(params["conv_w"]), full2d(params["conv_b"]),
        full2d(params["cls"]), full2d(params["pos"]),
        per_layer(params["ln1_g"]), per_layer(params["ln1_b"]),
        per_layer(params["wqkv"]), per_layer(params["bqkv"]),
        per_layer(params["wout"]), per_layer(params["bout"]),
        per_layer(params["ln2_g"]), per_layer(params["ln2_b"]),
        per_layer(params["wm1"]), per_layer(params["bm1"]),
        per_layer(params["wm2"]), per_layer(params["bm2"]),
        full2d(params["lnf_g"]), full2d(params["lnf_b"]),
        full2d(params["head_w"]), full2d(params["head_b"]),
    ]

    kern = partial(_vit_fused_kernel, batch=B, seq=S, n_patch=n)
    out = pl.pallas_call(
        kern,
        grid_spec=pltpu.PrefetchScalarGridSpec(
            num_scalar_prefetch=0,
            grid=(LAYERS,),
            in_specs=in_specs,
            out_specs=pl.BlockSpec((B * S, NPAD), lambda l: (0, 0)),
            scratch_shapes=[
                pltpu.VMEM((B * S, DIM), jnp.float32),       # resident activations
                pltpu.VMEM((B * S, 3 * DIM), jnp.float32),   # qkv projections
                pltpu.VMEM((B * S, DIM), jnp.float32),       # attention assembly
            ],
        ),
        out_shape=jax.ShapeDtypeStruct((B * S, NPAD), jnp.float32),
        compiler_params=pltpu.CompilerParams(
            dimension_semantics=("arbitrary",)),  # sequential dependency over layers
    )(*args)

    # class-token row per batch, real classes only
    return out.reshape(B, S, NPAD)[:, 0, :NUM_CLASSES]


# --------------------------------- main --------------------------------------
if __name__ == "__main__":
    key = jax.random.PRNGKey(0)
    k_param, k_x = jax.random.split(key)
    params = init_params(k_param)
    x = jax.random.normal(k_x, (2, CH, IMG, IMG), dtype=jnp.float32)

    fwd = jax.jit(vit_forward)
    logits = fwd(params, x)
    jax.block_until_ready(logits)

    assert logits.shape == (2, NUM_CLASSES)
    assert bool(jnp.all(jnp.isfinite(logits)))
    print("KERNEL_OK")
</pallas_src>

<mosaic_0001>
module attributes {stable_mosaic.version = 11 : i64} {
  func.func @_vit_fused_kernel(%arg0: i32, %arg1: memref<8x192xf32, #tpu.memory_space<vmem>>, %arg2: memref<192x32xf32, #tpu.memory_space<vmem>>, %arg3: memref<1x32xf32, #tpu.memory_space<vmem>>, %arg4: memref<1x32xf32, #tpu.memory_space<vmem>>, %arg5: memref<5x32xf32, #tpu.memory_space<vmem>>, %arg6: memref<1x1x32xf32, #tpu.memory_space<vmem>>, %arg7: memref<1x1x32xf32, #tpu.memory_space<vmem>>, %arg8: memref<1x32x96xf32, #tpu.memory_space<vmem>>, %arg9: memref<1x1x96xf32, #tpu.memory_space<vmem>>, %arg10: memref<1x32x32xf32, #tpu.memory_space<vmem>>, %arg11: memref<1x1x32xf32, #tpu.memory_space<vmem>>, %arg12: memref<1x1x32xf32, #tpu.memory_space<vmem>>, %arg13: memref<1x1x32xf32, #tpu.memory_space<vmem>>, %arg14: memref<1x32x64xf32, #tpu.memory_space<vmem>>, %arg15: memref<1x1x64xf32, #tpu.memory_space<vmem>>, %arg16: memref<1x64x32xf32, #tpu.memory_space<vmem>>, %arg17: memref<1x1x32xf32, #tpu.memory_space<vmem>>, %arg18: memref<1x32xf32, #tpu.memory_space<vmem>>, %arg19: memref<1x32xf32, #tpu.memory_space<vmem>>, %arg20: memref<32x128xf32, #tpu.memory_space<vmem>>, %arg21: memref<1x128xf32, #tpu.memory_space<vmem>>, %arg22: memref<10x128xf32, #tpu.memory_space<vmem>>, %arg23: memref<10x32xf32, #tpu.memory_space<vmem>>, %arg24: memref<10x96xf32, #tpu.memory_space<vmem>>, %arg25: memref<10x32xf32, #tpu.memory_space<vmem>>) attributes {dimension_semantics = [#tpu.dimension_semantics<arbitrary>], iteration_bounds = array<i64: 2>, scalar_prefetch = 0 : i64, scratch_operands = 3 : i64, tpu.core_type = #tpu.core_type<tc>, window_params = [{pipeline_mode = #tpu.pipeline_mode<synchronous>, transform_indices = @transform_0, window_bounds = array<i64: 8, 192>}, {pipeline_mode = #tpu.pipeline_mode<synchronous>, transform_indices = @transform_1, window_bounds = array<i64: 192, 32>}, {pipeline_mode = #tpu.pipeline_mode<synchronous>, transform_indices = @transform_2, window_bounds = array<i64: 1, 32>}, {pipeline_mode = #tpu.pipeline_mode<synchronous>, transform_indices = @transform_3, window_bounds = array<i64: 1, 32>}, {pipeline_mode = #tpu.pipeline_mode<synchronous>, transform_indices = @transform_4, window_bounds = array<i64: 5, 32>}, {transform_indices = @transform_5, window_bounds = array<i64: 1, 1, 32>}, {transform_indices = @transform_6, window_bounds = array<i64: 1, 1, 32>}, {transform_indices = @transform_7, window_bounds = array<i64: 1, 32, 96>}, {transform_indices = @transform_8, window_bounds = array<i64: 1, 1, 96>}, {transform_indices = @transform_9, window_bounds = array<i64: 1, 32, 32>}, {transform_indices = @transform_10, window_bounds = array<i64: 1, 1, 32>}, {transform_indices = @transform_11, window_bounds = array<i64: 1, 1, 32>}, {transform_indices = @transform_12, window_bounds = array<i64: 1, 1, 32>}, {transform_indices = @transform_13, window_bounds = array<i64: 1, 32, 64>}, {transform_indices = @transform_14, window_bounds = array<i64: 1, 1, 64>}, {transform_indices = @transform_15, window_bounds = array<i64: 1, 64, 32>}, {transform_indices = @transform_16, window_bounds = array<i64: 1, 1, 32>}, {pipeline_mode = #tpu.pipeline_mode<synchronous>, transform_indices = @transform_17, window_bounds = array<i64: 1, 32>}, {pipeline_mode = #tpu.pipeline_mode<synchronous>, transform_indices = @transform_18, window_bounds = array<i64: 1, 32>}, {pipeline_mode = #tpu.pipeline_mode<synchronous>, transform_indices = @transform_19, window_bounds = array<i64: 32, 128>}, {pipeline_mode = #tpu.pipeline_mode<synchronous>, transform_indices = @transform_20, window_bounds = array<i64: 1, 128>}, {pipeline_mode = #tpu.pipeline_mode<synchronous>, transform_indices = @transform_21, window_bounds = array<i64: 10, 128>}]} {
    %c0_i32 = arith.constant 0 : i32
    %0 = arith.cmpi eq, %arg0, %c0_i32 : i32
    %1 = arith.extui %0 : i1 to i32
    %c0_i32_0 = arith.constant 0 : i32
    %2 = arith.cmpi ne, %1, %c0_i32_0 : i32
    scf.if %2 {
      %c0_153 = arith.constant 0 : index
      %c0_154 = arith.constant 0 : index
      %244 = vector.load %arg1[%c0_153, %c0_154] : memref<8x192xf32, #tpu.memory_space<vmem>>, vector<8x192xf32>
      %c0_155 = arith.constant 0 : index
      %c0_156 = arith.constant 0 : index
      %245 = vector.load %arg2[%c0_155, %c0_156] : memref<192x32xf32, #tpu.memory_space<vmem>>, vector<192x32xf32>
      %cst_157 = arith.constant dense<0.000000e+00> : vector<8x32xf32>
      %246 = tpu.matmul %244, %245, %cst_157 {dimension_numbers = #tpu.dot_dimension_numbers<[1], [0], [0], [1], [0, 0, 1, 1], [], []>} : vector<8x192xf32>, vector<192x32xf32>, vector<8x32xf32> -> vector<8x32xf32>
      %c0_158 = arith.constant 0 : index
      %c0_159 = arith.constant 0 : index
      %247 = vector.load %arg3[%c0_158, %c0_159] : memref<1x32xf32, #tpu.memory_space<vmem>>, vector<1x32xf32>
      %248 = vector.broadcast %247 : vector<1x32xf32> to vector<8x32xf32>
      %249 = arith.addf %246, %248 : vector<8x32xf32>
      %c0_160 = arith.constant 0 : index
      %c0_161 = arith.constant 0 : index
      %250 = vector.load %arg4[%c0_160, %c0_161] : memref<1x32xf32, #tpu.memory_space<vmem>>, vector<1x32xf32>
      %c0_162 = arith.constant 0 : index
      %c0_163 = arith.constant 0 : index
      %251 = vector.load %arg5[%c0_162, %c0_163] : memref<5x32xf32, #tpu.memory_space<vmem>>, vector<1x32xf32>
      %252 = arith.addf %250, %251 : vector<1x32xf32>
      %c0_164 = arith.constant 0 : index
      %c0_165 = arith.constant 0 : index
      %253 = vector.load %arg23[%c0_164, %c0_165] : memref<10x32xf32, #tpu.memory_space<vmem>>, vector<1x32xf32>
      tpu.vector_store %arg23[%c0_164, %c0_165], %252 {strides = array<i32>} : memref<10x32xf32, #tpu.memory_space<vmem>>, vector<1x32xf32>,
      %254 = vector.extract_strided_slice %249 {offsets = [0, 0], sizes = [4, 32], strides = [1, 1]} : vector<8x32xf32> to vector<4x32xf32>
      %c1 = arith.constant 1 : index
      %c0_166 = arith.constant 0 : index
      %255 = vector.load %arg5[%c1, %c0_166] : memref<5x32xf32, #tpu.memory_space<vmem>>, vector<4x32xf32>
      %256 = arith.addf %254, %255 : vector<4x32xf32>
      %c1_167 = arith.constant 1 : index
      %c0_168 = arith.constant 0 : index
      %257 = vector.load %arg23[%c1_167, %c0_168] : memref<10x32xf32, #tpu.memory_space<vmem>>, vector<4x32xf32>
      tpu.vector_store %arg23[%c1_167, %c0_168], %256 {strides = array<i32>} : memref<10x32xf32, #tpu.memory_space<vmem>>, vector<4x32xf32>,
      %c0_169 = arith.constant 0 : index
      %c0_170 = arith.constant 0 : index
      %258 = vector.load %arg4[%c0_169, %c0_170] : memref<1x32xf32, #tpu.memory_space<vmem>>, vector<1x32xf32>
      %c0_171 = arith.constant 0 : index
      %c0_172 = arith.constant 0 : index
      %259 = vector.load %arg5[%c0_171, %c0_172] : memref<5x32xf32, #tpu.memory_space<vmem>>, vector<1x32xf32>
      %260 = arith.addf %258, %259 : vector<1x32xf32>
      %c5_173 = arith.constant 5 : index
      %c0_174 = arith.constant 0 : index
      %261 = vector.load %arg23[%c5_173, %c0_174] : memref<10x32xf32, #tpu.memory_space<vmem>>, vector<1x32xf32>
      tpu.vector_store %arg23[%c5_173, %c0_174], %260 {strides = array<i32>} : memref<10x32xf32, #tpu.memory_space<vmem>>, vector<1x32xf32>,
      %262 = vector.extract_strided_slice %249 {offsets = [4, 0], sizes = [4, 32], strides = [1, 1]} : vector<8x32xf32> to vector<4x32xf32>
      %c1_175 = arith.constant 1 : index
      %c0_176 = arith.constant 0 : index
      %263 = vector.load %arg5[%c1_175, %c0_176] : memref<5x32xf32, #tpu.memory_space<vmem>>, vector<4x32xf32>
      %264 = arith.addf %262, %263 : vector<4x32xf32>
      %c6 = arith.constant 6 : index
      %c0_177 = arith.constant 0 : index
      %265 = vector.load %arg23[%c6, %c0_177] : memref<10x32xf32, #tpu.memory_space<vmem>>, vector<4x32xf32>
      tpu.vector_store %arg23[%c6, %c0_177], %264 {strides = array<i32>} : memref<10x32xf32, #tpu.memory_space<vmem>>, vector<4x32xf32>,
    } else {
    }
    %c0 = arith.constant 0 : index
    %c0_1 = arith.constant 0 : index
    %3 = vector.load %arg23[%c0, %c0_1] : memref<10x32xf32, #tpu.memory_space<vmem>>, vector<10x32xf32>
    %c0_2 = arith.constant 0 : index
    %c0_3 = arith.constant 0 : index
    %c0_4 = arith.constant 0 : index
    %4 = vector.load %arg6[%c0_2, %c0_3, %c0_4] : memref<1x1x32xf32, #tpu.memory_space<vmem>>, vector<1x1x32xf32>
    %5 = vector.shape_cast %4 : vector<1x1x32xf32> to vector<1x32xf32>
    %c0_5 = arith.constant 0 : index
    %c0_6 = arith.constant 0 : index
    %c0_7 = arith.constant 0 : index
    %6 = vector.load %arg7[%c0_5, %c0_6, %c0_7] : memref<1x1x32xf32, #tpu.memory_space<vmem>>, vector<1x1x32xf32>
    %7 = vector.shape_cast %6 : vector<1x1x32xf32> to vector<1x32xf32>
    %cst = arith.constant dense<0.000000e+00> : vector<10xf32>
    %8 = vector.multi_reduction <add>, %3, %cst [1] : vector<10x32xf32> to vector<10xf32>
    %9 = vector.shape_cast %8 : vector<10xf32> to vector<10x1xf32>
    %cst_8 = arith.constant 3.200000e+01 : f32
    %10 = vector.broadcast %cst_8 : f32 to vector<10x1xf32>
    %11 = arith.divf %9, %10 : vector<10x1xf32>
    %12 = vector.broadcast %11 : vector<10x1xf32> to vector<10x32xf32>
    %13 = arith.subf %3, %12 : vector<10x32xf32>
    %14 = arith.mulf %13, %13 : vector<10x32xf32>
    %cst_9 = arith.constant dense<0.000000e+00> : vector<10xf32>
    %15 = vector.multi_reduction <add>, %14, %cst_9 [1] : vector<10x32xf32> to vector<10xf32>
    %16 = vector.shape_cast %15 : vector<10xf32> to vector<10x1xf32>
    %cst_10 = arith.constant 3.200000e+01 : f32
    %17 = vector.broadcast %cst_10 : f32 to vector<10x1xf32>
    %18 = arith.divf %16, %17 : vector<10x1xf32>
    %19 = vector.broadcast %11 : vector<10x1xf32> to vector<10x32xf32>
    %20 = arith.subf %3, %19 : vector<10x32xf32>
    %cst_11 = arith.constant 9.99999997E-7 : f32
    %21 = vector.broadcast %cst_11 : f32 to vector<10x1xf32>
    %22 = arith.addf %18, %21 : vector<10x1xf32>
    %23 = math.rsqrt %22 : vector<10x1xf32>
    %24 = vector.broadcast %23 : vector<10x1xf32> to vector<10x32xf32>
    %25 = arith.mulf %20, %24 : vector<10x32xf32>
    %26 = vector.broadcast %5 : vector<1x32xf32> to vector<10x32xf32>
    %27 = arith.mulf %25, %26 : vector<10x32xf32>
    %28 = vector.broadcast %7 : vector<1x32xf32> to vector<10x32xf32>
    %29 = arith.addf %27, %28 : vector<10x32xf32>
    %c0_12 = arith.constant 0 : index
    %c0_13 = arith.constant 0 : index
    %c0_14 = arith.constant 0 : index
    %30 = vector.load %arg8[%c0_12, %c0_13, %c0_14] : memref<1x32x96xf32, #tpu.memory_space<vmem>>, vector<1x32x96xf32>
    %31 = vector.shape_cast %30 : vector<1x32x96xf32> to vector<32x96xf32>
    %cst_15 = arith.constant dense<0.000000e+00> : vector<10x96xf32>
    %32 = tpu.matmul %29, %31, %cst_15 {dimension_numbers = #tpu.dot_dimension_numbers<[1], [0], [0], [1], [0, 0, 1, 1], [], []>} : vector<10x32xf32>, vector<32x96xf32>, vector<10x96xf32> -> vector<10x96xf32>
    %c0_16 = arith.constant 0 : index
    %c0_17 = arith.constant 0 : index
    %c0_18 = arith.constant 0 : index
    %33 = vector.load %arg9[%c0_16, %c0_17, %c0_18] : memref<1x1x96xf32, #tpu.memory_space<vmem>>, vector<1x1x96xf32>
    %34 = vector.shape_cast %33 : vector<1x1x96xf32> to vector<1x96xf32>
    %35 = vector.broadcast %34 : vector<1x96xf32> to vector<10x96xf32>
    %36 = arith.addf %32, %35 : vector<10x96xf32>
    %c0_19 = arith.constant 0 : index
    %c0_20 = arith.constant 0 : index
    %37 = vector.load %arg24[%c0_19, %c0_20] : memref<10x96xf32, #tpu.memory_space<vmem>>, vector<10x96xf32>
    tpu.vector_store %arg24[%c0_19, %c0_20], %36 {strides = array<i32>} : memref<10x96xf32, #tpu.memory_space<vmem>>, vector<10x96xf32>,
    %c0_21 = arith.constant 0 : index
    %c0_22 = arith.constant 0 : index
    %38 = vector.load %arg24[%c0_21, %c0_22] : memref<10x96xf32, #tpu.memory_space<vmem>>, vector<5x8xf32>
    %c0_23 = arith.constant 0 : index
    %c32 = arith.constant 32 : index
    %39 = vector.load %arg24[%c0_23, %c32] : memref<10x96xf32, #tpu.memory_space<vmem>>, vector<5x8xf32>
    %c0_24 = arith.constant 0 : index
    %c64 = arith.constant 64 : index
    %40 = vector.load %arg24[%c0_24, %c64] : memref<10x96xf32, #tpu.memory_space<vmem>>, vector<5x8xf32>
    %cst_25 = arith.constant dense<0.000000e+00> : vector<5x5xf32>
    %41 = tpu.matmul %38, %39, %cst_25 {dimension_numbers = #tpu.dot_dimension_numbers<[1], [1], [0], [0], [0, 0, 1, 0], [], []>} : vector<5x8xf32>, vector<5x8xf32>, vector<5x5xf32> -> vector<5x5xf32>
    %cst_26 = arith.constant 0.353553385 : f32
    %42 = vector.broadcast %cst_26 : f32 to vector<5x5xf32>
    %43 = arith.mulf %41, %42 : vector<5x5xf32>
    %cst_27 = arith.constant dense<0xFF800000> : vector<5xf32>
    %44 = vector.multi_reduction <maximumf>, %43, %cst_27 [1] : vector<5x5xf32> to vector<5xf32>
    %45 = vector.shape_cast %44 : vector<5xf32> to vector<5x1xf32>
    %46 = vector.broadcast %45 : vector<5x1xf32> to vector<5x5xf32>
    %47 = arith.subf %43, %46 : vector<5x5xf32>
    %48 = math.exp %47 : vector<5x5xf32>
    %cst_28 = arith.constant dense<0.000000e+00> : vector<5xf32>
    %49 = vector.multi_reduction <add>, %48, %cst_28 [1] : vector<5x5xf32> to vector<5xf32>
    %50 = vector.shape_cast %49 : vector<5xf32> to vector<5x1xf32>
    %51 = tpu.reciprocal %50 {approx = true} : vector<5x1xf32> -> vector<5x1xf32>
    %52 = vector.broadcast %51 : vector<5x1xf32> to vector<5x5xf32>
    %53 = arith.mulf %48, %52 : vector<5x5xf32>
    %cst_29 = arith.constant dense<0.000000e+00> : vector<5x8xf32>
    %54 = tpu.matmul %53, %40, %cst_29 {dimension_numbers = #tpu.dot_dimension_numbers<[1], [0], [0], [1], [0, 0, 1, 1], [], []>} : vector<5x5xf32>, vector<5x8xf32>, vector<5x8xf32> -> vector<5x8xf32>
    %c0_30 = arith.constant 0 : index
    %c0_31 = arith.constant 0 : index
    %55 = vector.load %arg25[%c0_30, %c0_31] : memref<10x32xf32, #tpu.memory_space<vmem>>, vector<5x8xf32>
    tpu.vector_store %arg25[%c0_30, %c0_31], %54 {strides = array<i32>} : memref<10x32xf32, #tpu.memory_space<vmem>>, vector<5x8xf32>,
    %c0_32 = arith.constant 0 : index
    %c8 = arith.constant 8 : index
    %56 = vector.load %arg24[%c0_32, %c8] : memref<10x96xf32, #tpu.memory_space<vmem>>, vector<5x8xf32>
    %c0_33 = arith.constant 0 : index
    %c40 = arith.constant 40 : index
    %57 = vector.load %arg24[%c0_33, %c40] : memref<10x96xf32, #tpu.memory_space<vmem>>, vector<5x8xf32>
    %c0_34 = arith.constant 0 : index
    %c72 = arith.constant 72 : index
    %58 = vector.load %arg24[%c0_34, %c72] : memref<10x96xf32, #tpu.memory_space<vmem>>, vector<5x8xf32>
    %cst_35 = arith.constant dense<0.000000e+00> : vector<5x5xf32>
    %59 = tpu.matmul %56, %57, %cst_35 {dimension_numbers = #tpu.dot_dimension_numbers<[1], [1], [0], [0], [0, 0, 1, 0], [], []>} : vector<5x8xf32>, vector<5x8xf32>, vector<5x5xf32> -> vector<5x5xf32>
    %cst_36 = arith.constant 0.353553385 : f32
    %60 = vector.broadcast %cst_36 : f32 to vector<5x5xf32>
    %61 = arith.mulf %59, %60 : vector<5x5xf32>
    %cst_37 = arith.constant dense<0xFF800000> : vector<5xf32>
    %62 = vector.multi_reduction <maximumf>, %61, %cst_37 [1] : vector<5x5xf32> to vector<5xf32>
    %63 = vector.shape_cast %62 : vector<5xf32> to vector<5x1xf32>
    %64 = vector.broadcast %63 : vector<5x1xf32> to vector<5x5xf32>
    %65 = arith.subf %61, %64 : vector<5x5xf32>
    %66 = math.exp %65 : vector<5x5xf32>
    %cst_38 = arith.constant dense<0.000000e+00> : vector<5xf32>
    %67 = vector.multi_reduction <add>, %66, %cst_38 [1] : vector<5x5xf32> to vector<5xf32>
    %68 = vector.shape_cast %67 : vector<5xf32> to vector<5x1xf32>
    %69 = tpu.reciprocal %68 {approx = true} : vector<5x1xf32> -> vector<5x1xf32>
    %70 = vector.broadcast %69 : vector<5x1xf32> to vector<5x5xf32>
    %71 = arith.mulf %66, %70 : vector<5x5xf32>
    %cst_39 = arith.constant dense<0.000000e+00> : vector<5x8xf32>
    %72 = tpu.matmul %71, %58, %cst_39 {dimension_numbers = #tpu.dot_dimension_numbers<[1], [0], [0], [1], [0, 0, 1, 1], [], []>} : vector<5x5xf32>, vector<5x8xf32>, vector<5x8xf32> -> vector<5x8xf32>
    %c0_40 = arith.constant 0 : index
    %c8_41 = arith.constant 8 : index
    %73 = vector.load %arg25[%c0_40, %c8_41] : memref<10x32xf32, #tpu.memory_space<vmem>>, vector<5x8xf32>
    tpu.vector_store %arg25[%c0_40, %c8_41], %72 {strides = array<i32>} : memref<10x32xf32, #tpu.memory_space<vmem>>, vector<5x8xf32>,
    %c0_42 = arith.constant 0 : index
    %c16 = arith.constant 16 : index
    %74 = vector.load %arg24[%c0_42, %c16] : memref<10x96xf32, #tpu.memory_space<vmem>>, vector<5x8xf32>
    %c0_43 = arith.constant 0 : index
    %c48 = arith.constant 48 : index
    %75 = vector.load %arg24[%c0_43, %c48] : memref<10x96xf32, #tpu.memory_space<vmem>>, vector<5x8xf32>
    %c0_44 = arith.constant 0 : index
    %c80 = arith.constant 80 : index
    %76 = vector.load %arg24[%c0_44, %c80] : memref<10x96xf32, #tpu.memory_space<vmem>>, vector<5x8xf32>
    %cst_45 = arith.constant dense<0.000000e+00> : vector<5x5xf32>
    %77 = tpu.matmul %74, %75, %cst_45 {dimension_numbers = #tpu.dot_dimension_numbers<[1], [1], [0], [0], [0, 0, 1, 0], [], []>} : vector<5x8xf32>, vector<5x8xf32>, vector<5x5xf32> -> vector<5x5xf32>
    %cst_46 = arith.constant 0.353553385 : f32
    %78 = vector.broadcast %cst_46 : f32 to vector<5x5xf32>
    %79 = arith.mulf %77, %78 : vector<5x5xf32>
    %cst_47 = arith.constant dense<0xFF800000> : vector<5xf32>
    %80 = vector.multi_reduction <maximumf>, %79, %cst_47 [1] : vector<5x5xf32> to vector<5xf32>
    %81 = vector.shape_cast %80 : vector<5xf32> to vector<5x1xf32>
    %82 = vector.broadcast %81 : vector<5x1xf32> to vector<5x5xf32>
    %83 = arith.subf %79, %82 : vector<5x5xf32>
    %84 = math.exp %83 : vector<5x5xf32>
    %cst_48 = arith.constant dense<0.000000e+00> : vector<5xf32>
    %85 = vector.multi_reduction <add>, %84, %cst_48 [1] : vector<5x5xf32> to vector<5xf32>
    %86 = vector.shape_cast %85 : vector<5xf32> to vector<5x1xf32>
    %87 = tpu.reciprocal %86 {approx = true} : vector<5x1xf32> -> vector<5x1xf32>
    %88 = vector.broadcast %87 : vector<5x1xf32> to vector<5x5xf32>
    %89 = arith.mulf %84, %88 : vector<5x5xf32>
    %cst_49 = arith.constant dense<0.000000e+00> : vector<5x8xf32>
    %90 = tpu.matmul %89, %76, %cst_49 {dimension_numbers = #tpu.dot_dimension_numbers<[1], [0], [0], [1], [0, 0, 1, 1], [], []>} : vector<5x5xf32>, vector<5x8xf32>, vector<5x8xf32> -> vector<5x8xf32>
    %c0_50 = arith.constant 0 : index
    %c16_51 = arith.constant 16 : index
    %91 = vector.load %arg25[%c0_50, %c16_51] : memref<10x32xf32, #tpu.memory_space<vmem>>, vector<5x8xf32>
    tpu.vector_store %arg25[%c0_50, %c16_51], %90 {strides = array<i32>} : memref<10x32xf32, #tpu.memory_space<vmem>>, vector<5x8xf32>,
    %c0_52 = arith.constant 0 : index
    %c24 = arith.constant 24 : index
    %92 = vector.load %arg24[%c0_52, %c24] : memref<10x96xf32, #tpu.memory_space<vmem>>, vector<5x8xf32>
    %c0_53 = arith.constant 0 : index
    %c56 = arith.constant 56 : index
    %93 = vector.load %arg24[%c0_53, %c56] : memref<10x96xf32, #tpu.memory_space<vmem>>, vector<5x8xf32>
    %c0_54 = arith.constant 0 : index
    %c88 = arith.constant 88 : index
    %94 = vector.load %arg24[%c0_54, %c88] : memref<10x96xf32, #tpu.memory_space<vmem>>, vector<5x8xf32>
    %cst_55 = arith.constant dense<0.000000e+00> : vector<5x5xf32>
    %95 = tpu.matmul %92, %93, %cst_55 {dimension_numbers = #tpu.dot_dimension_numbers<[1], [1], [0], [0], [0, 0, 1, 0], [], []>} : vector<5x8xf32>, vector<5x8xf32>, vector<5x5xf32> -> vector<5x5xf32>
    %cst_56 = arith.constant 0.353553385 : f32
    %96 = vector.broadcast %cst_56 : f32 to vector<5x5xf32>
    %97 = arith.mulf %95, %96 : vector<5x5xf32>
    %cst_57 = arith.constant dense<0xFF800000> : vector<5xf32>
    %98 = vector.multi_reduction <maximumf>, %97, %cst_57 [1] : vector<5x5xf32> to vector<5xf32>
    %99 = vector.shape_cast %98 : vector<5xf32> to vector<5x1xf32>
    %100 = vector.broadcast %99 : vector<5x1xf32> to vector<5x5xf32>
    %101 = arith.subf %97, %100 : vector<5x5xf32>
    %102 = math.exp %101 : vector<5x5xf32>
    %cst_58 = arith.constant dense<0.000000e+00> : vector<5xf32>
    %103 = vector.multi_reduction <add>, %102, %cst_58 [1] : vector<5x5xf32> to vector<5xf32>
    %104 = vector.shape_cast %103 : vector<5xf32> to vector<5x1xf32>
    %105 = tpu.reciprocal %104 {approx = true} : vector<5x1xf32> -> vector<5x1xf32>
    %106 = vector.broadcast %105 : vector<5x1xf32> to vector<5x5xf32>
    %107 = arith.mulf %102, %106 : vector<5x5xf32>
    %cst_59 = arith.constant dense<0.000000e+00> : vector<5x8xf32>
    %108 = tpu.matmul %107, %94, %cst_59 {dimension_numbers = #tpu.dot_dimension_numbers<[1], [0], [0], [1], [0, 0, 1, 1], [], []>} : vector<5x5xf32>, vector<5x8xf32>, vector<5x8xf32> -> vector<5x8xf32>
    %c0_60 = arith.constant 0 : index
    %c24_61 = arith.constant 24 : index
    %109 = vector.load %arg25[%c0_60, %c24_61] : memref<10x32xf32, #tpu.memory_space<vmem>>, vector<5x8xf32>
    tpu.vector_store %arg25[%c0_60, %c24_61], %108 {strides = array<i32>} : memref<10x32xf32, #tpu.memory_space<vmem>>, vector<5x8xf32>,
    %c5 = arith.constant 5 : index
    %c0_62 = arith.constant 0 : index
    %110 = vector.load %arg24[%c5, %c0_62] : memref<10x96xf32, #tpu.memory_space<vmem>>, vector<5x8xf32>
    %c5_63 = arith.constant 5 : index
    %c32_64 = arith.constant 32 : index
    %111 = vector.load %arg24[%c5_63, %c32_64] : memref<10x96xf32, #tpu.memory_space<vmem>>, vector<5x8xf32>
    %c5_65 = arith.constant 5 : index
    %c64_66 = arith.constant 64 : index
    %112 = vector.load %arg24[%c5_65, %c64_66] : memref<10x96xf32, #tpu.memory_space<vmem>>, vector<5x8xf32>
    %cst_67 = arith.constant dense<0.000000e+00> : vector<5x5xf32>
    %113 = tpu.matmul %110, %111, %cst_67 {dimension_numbers = #tpu.dot_dimension_numbers<[1], [1], [0], [0], [0, 0, 1, 0], [], []>} : vector<5x8xf32>, vector<5x8xf32>, vector<5x5xf32> -> vector<5x5xf32>
    %cst_68 = arith.constant 0.353553385 : f32
    %114 = vector.broadcast %cst_68 : f32 to vector<5x5xf32>
    %115 = arith.mulf %113, %114 : vector<5x5xf32>
    %cst_69 = arith.constant dense<0xFF800000> : vector<5xf32>
    %116 = vector.multi_reduction <maximumf>, %115, %cst_69 [1] : vector<5x5xf32> to vector<5xf32>
    %117 = vector.shape_cast %116 : vector<5xf32> to vector<5x1xf32>
    %118 = vector.broadcast %117 : vector<5x1xf32> to vector<5x5xf32>
    %119 = arith.subf %115, %118 : vector<5x5xf32>
    %120 = math.exp %119 : vector<5x5xf32>
    %cst_70 = arith.constant dense<0.000000e+00> : vector<5xf32>
    %121 = vector.multi_reduction <add>, %120, %cst_70 [1] : vector<5x5xf32> to vector<5xf32>
    %122 = vector.shape_cast %121 : vector<5xf32> to vector<5x1xf32>
    %123 = tpu.reciprocal %122 {approx = true} : vector<5x1xf32> -> vector<5x1xf32>
    %124 = vector.broadcast %123 : vector<5x1xf32> to vector<5x5xf32>
    %125 = arith.mulf %120, %124 : vector<5x5xf32>
    %cst_71 = arith.constant dense<0.000000e+00> : vector<5x8xf32>
    %126 = tpu.matmul %125, %112, %cst_71 {dimension_numbers = #tpu.dot_dimension_numbers<[1], [0], [0], [1], [0, 0, 1, 1], [], []>} : vector<5x5xf32>, vector<5x8xf32>, vector<5x8xf32> -> vector<5x8xf32>
    %c5_72 = arith.constant 5 : index
    %c0_73 = arith.constant 0 : index
    %127 = vector.load %arg25[%c5_72, %c0_73] : memref<10x32xf32, #tpu.memory_space<vmem>>, vector<5x8xf32>
    tpu.vector_store %arg25[%c5_72, %c0_73], %126 {strides = array<i32>} : memref<10x32xf32, #tpu.memory_space<vmem>>, vector<5x8xf32>,
    %c5_74 = arith.constant 5 : index
    %c8_75 = arith.constant 8 : index
    %128 = vector.load %arg24[%c5_74, %c8_75] : memref<10x96xf32, #tpu.memory_space<vmem>>, vector<5x8xf32>
    %c5_76 = arith.constant 5 : index
    %c40_77 = arith.constant 40 : index
    %129 = vector.load %arg24[%c5_76, %c40_77] : memref<10x96xf32, #tpu.memory_space<vmem>>, vector<5x8xf32>
    %c5_78 = arith.constant 5 : index
    %c72_79 = arith.constant 72 : index
    %130 = vector.load %arg24[%c5_78, %c72_79] : memref<10x96xf32, #tpu.memory_space<vmem>>, vector<5x8xf32>
    %cst_80 = arith.constant dense<0.000000e+00> : vector<5x5xf32>
    %131 = tpu.matmul %128, %129, %cst_80 {dimension_numbers = #tpu.dot_dimension_numbers<[1], [1], [0], [0], [0, 0, 1, 0], [], []>} : vector<5x8xf32>, vector<5x8xf32>, vector<5x5xf32> -> vector<5x5xf32>
    %cst_81 = arith.constant 0.353553385 : f32
    %132 = vector.broadcast %cst_81 : f32 to vector<5x5xf32>
    %133 = arith.mulf %131, %132 : vector<5x5xf32>
    %cst_82 = arith.constant dense<0xFF800000> : vector<5xf32>
    %134 = vector.multi_reduction <maximumf>, %133, %cst_82 [1] : vector<5x5xf32> to vector<5xf32>
    %135 = vector.shape_cast %134 : vector<5xf32> to vector<5x1xf32>
    %136 = vector.broadcast %135 : vector<5x1xf32> to vector<5x5xf32>
    %137 = arith.subf %133, %136 : vector<5x5xf32>
    %138 = math.exp %137 : vector<5x5xf32>
    %cst_83 = arith.constant dense<0.000000e+00> : vector<5xf32>
    %139 = vector.multi_reduction <add>, %138, %cst_83 [1] : vector<5x5xf32> to vector<5xf32>
    %140 = vector.shape_cast %139 : vector<5xf32> to vector<5x1xf32>
    %141 = tpu.reciprocal %140 {approx = true} : vector<5x1xf32> -> vector<5x1xf32>
    %142 = vector.broadcast %141 : vector<5x1xf32> to vector<5x5xf32>
    %143 = arith.mulf %138, %142 : vector<5x5xf32>
    %cst_84 = arith.constant dense<0.000000e+00> : vector<5x8xf32>
    %144 = tpu.matmul %143, %130, %cst_84 {dimension_numbers = #tpu.dot_dimension_numbers<[1], [0], [0], [1], [0, 0, 1, 1], [], []>} : vector<5x5xf32>, vector<5x8xf32>, vector<5x8xf32> -> vector<5x8xf32>
    %c5_85 = arith.constant 5 : index
    %c8_86 = arith.constant 8 : index
    %145 = vector.load %arg25[%c5_85, %c8_86] : memref<10x32xf32, #tpu.memory_space<vmem>>, vector<5x8xf32>
    tpu.vector_store %arg25[%c5_85, %c8_86], %144 {strides = array<i32>} : memref<10x32xf32, #tpu.memory_space<vmem>>, vector<5x8xf32>,
    %c5_87 = arith.constant 5 : index
    %c16_88 = arith.constant 16 : index
    %146 = vector.load %arg24[%c5_87, %c16_88] : memref<10x96xf32, #tpu.memory_space<vmem>>, vector<5x8xf32>
    %c5_89 = arith.constant 5 : index
    %c48_90 = arith.constant 48 : index
    %147 = vector.load %arg24[%c5_89, %c48_90] : memref<10x96xf32, #tpu.memory_space<vmem>>, vector<5x8xf32>
    %c5_91 = arith.constant 5 : index
    %c80_92 = arith.constant 80 : index
    %148 = vector.load %arg24[%c5_91, %c80_92] : memref<10x96xf32, #tpu.memory_space<vmem>>, vector<5x8xf32>
    %cst_93 = arith.constant dense<0.000000e+00> : vector<5x5xf32>
    %149 = tpu.matmul %146, %147, %cst_93 {dimension_numbers = #tpu.dot_dimension_numbers<[1], [1], [0], [0], [0, 0, 1, 0], [], []>} : vector<5x8xf32>, vector<5x8xf32>, vector<5x5xf32> -> vector<5x5xf32>
    %cst_94 = arith.constant 0.353553385 : f32
    %150 = vector.broadcast %cst_94 : f32 to vector<5x5xf32>
    %151 = arith.mulf %149, %150 : vector<5x5xf32>
    %cst_95 = arith.constant dense<0xFF800000> : vector<5xf32>
    %152 = vector.multi_reduction <maximumf>, %151, %cst_95 [1] : vector<5x5xf32> to vector<5xf32>
    %153 = vector.shape_cast %152 : vector<5xf32> to vector<5x1xf32>
    %154 = vector.broadcast %153 : vector<5x1xf32> to vector<5x5xf32>
    %155 = arith.subf %151, %154 : vector<5x5xf32>
    %156 = math.exp %155 : vector<5x5xf32>
    %cst_96 = arith.constant dense<0.000000e+00> : vector<5xf32>
    %157 = vector.multi_reduction <add>, %156, %cst_96 [1] : vector<5x5xf32> to vector<5xf32>
    %158 = vector.shape_cast %157 : vector<5xf32> to vector<5x1xf32>
    %159 = tpu.reciprocal %158 {approx = true} : vector<5x1xf32> -> vector<5x1xf32>
    %160 = vector.broadcast %159 : vector<5x1xf32> to vector<5x5xf32>
    %161 = arith.mulf %156, %160 : vector<5x5xf32>
    %cst_97 = arith.constant dense<0.000000e+00> : vector<5x8xf32>
    %162 = tpu.matmul %161, %148, %cst_97 {dimension_numbers = #tpu.dot_dimension_numbers<[1], [0], [0], [1], [0, 0, 1, 1], [], []>} : vector<5x5xf32>, vector<5x8xf32>, vector<5x8xf32> -> vector<5x8xf32>
    %c5_98 = arith.constant 5 : index
    %c16_99 = arith.constant 16 : index
    %163 = vector.load %arg25[%c5_98, %c16_99] : memref<10x32xf32, #tpu.memory_space<vmem>>, vector<5x8xf32>
    tpu.vector_store %arg25[%c5_98, %c16_99], %162 {strides = array<i32>} : memref<10x32xf32, #tpu.memory_space<vmem>>, vector<5x8xf32>,
    %c5_100 = arith.constant 5 : index
    %c24_101 = arith.constant 24 : index
    %164 = vector.load %arg24[%c5_100, %c24_101] : memref<10x96xf32, #tpu.memory_space<vmem>>, vector<5x8xf32>
    %c5_102 = arith.constant 5 : index
    %c56_103 = arith.constant 56 : index
    %165 = vector.load %arg24[%c5_102, %c56_103] : memref<10x96xf32, #tpu.memory_space<vmem>>, vector<5x8xf32>
    %c5_104 = arith.constant 5 : index
    %c88_105 = arith.constant 88 : index
    %166 = vector.load %arg24[%c5_104, %c88_105] : memref<10x96xf32, #tpu.memory_space<vmem>>, vector<5x8xf32>
    %cst_106 = arith.constant dense<0.000000e+00> : vector<5x5xf32>
    %167 = tpu.matmul %164, %165, %cst_106 {dimension_numbers = #tpu.dot_dimension_numbers<[1], [1], [0], [0], [0, 0, 1, 0], [], []>} : vector<5x8xf32>, vector<5x8xf32>, vector<5x5xf32> -> vector<5x5xf32>
    %cst_107 = arith.constant 0.353553385 : f32
    %168 = vector.broadcast %cst_107 : f32 to vector<5x5xf32>
    %169 = arith.mulf %167, %168 : vector<5x5xf32>
    %cst_108 = arith.constant dense<0xFF800000> : vector<5xf32>
    %170 = vector.multi_reduction <maximumf>, %169, %cst_108 [1] : vector<5x5xf32> to vector<5xf32>
    %171 = vector.shape_cast %170 : vector<5xf32> to vector<5x1xf32>
    %172 = vector.broadcast %171 : vector<5x1xf32> to vector<5x5xf32>
    %173 = arith.subf %169, %172 : vector<5x5xf32>
    %174 = math.exp %173 : vector<5x5xf32>
    %cst_109 = arith.constant dense<0.000000e+00> : vector<5xf32>
    %175 = vector.multi_reduction <add>, %174, %cst_109 [1] : vector<5x5xf32> to vector<5xf32>
    %176 = vector.shape_cast %175 : vector<5xf32> to vector<5x1xf32>
    %177 = tpu.reciprocal %176 {approx = true} : vector<5x1xf32> -> vector<5x1xf32>
    %178 = vector.broadcast %177 : vector<5x1xf32> to vector<5x5xf32>
    %179 = arith.mulf %174, %178 : vector<5x5xf32>
    %cst_110 = arith.constant dense<0.000000e+00> : vector<5x8xf32>
    %180 = tpu.matmul %179, %166, %cst_110 {dimension_numbers = #tpu.dot_dimension_numbers<[1], [0], [0], [1], [0, 0, 1, 1], [], []>} : vector<5x5xf32>, vector<5x8xf32>, vector<5x8xf32> -> vector<5x8xf32>
    %c5_111 = arith.constant 5 : index
    %c24_112 = arith.constant 24 : index
    %181 = vector.load %arg25[%c5_111, %c24_112] : memref<10x32xf32, #tpu.memory_space<vmem>>, vector<5x8xf32>
    tpu.vector_store %arg25[%c5_111, %c24_112], %180 {strides = array<i32>} : memref<10x32xf32, #tpu.memory_space<vmem>>, vector<5x8xf32>,
    %c0_113 = arith.constant 0 : index
    %c0_114 = arith.constant 0 : index
    %182 = vector.load %arg25[%c0_113, %c0_114] : memref<10x32xf32, #tpu.memory_space<vmem>>, vector<10x32xf32>
    %c0_115 = arith.constant 0 : index
    %c0_116 = arith.constant 0 : index
    %c0_117 = arith.constant 0 : index
    %183 = vector.load %arg10[%c0_115, %c0_116, %c0_117] : memref<1x32x32xf32, #tpu.memory_space<vmem>>, vector<1x32x32xf32>
    %184 = vector.shape_cast %183 : vector<1x32x32xf32> to vector<32x32xf32>
    %cst_118 = arith.constant dense<0.000000e+00> : vector<10x32xf32>
    %185 = tpu.matmul %182, %184, %cst_118 {dimension_numbers = #tpu.dot_dimension_numbers<[1], [0], [0], [1], [0, 0, 1, 1], [], []>} : vector<10x32xf32>, vector<32x32xf32>, vector<10x32xf32> -> vector<10x32xf32>
    %c0_119 = arith.constant 0 : index
    %c0_120 = arith.constant 0 : index
    %c0_121 = arith.constant 0 : index
    %186 = vector.load %arg11[%c0_119, %c0_120, %c0_121] : memref<1x1x32xf32, #tpu.memory_space<vmem>>, vector<1x1x32xf32>
    %187 = vector.shape_cast %186 : vector<1x1x32xf32> to vector<1x32xf32>
    %188 = vector.broadcast %187 : vector<1x32xf32> to vector<10x32xf32>
    %189 = arith.addf %185, %188 : vector<10x32xf32>
    %190 = arith.addf %3, %189 : vector<10x32xf32>
    %c0_122 = arith.constant 0 : index
    %c0_123 = arith.constant 0 : index
    %c0_124 = arith.constant 0 : index
    %191 = vector.load %arg12[%c0_122, %c0_123, %c0_124] : memref<1x1x32xf32, #tpu.memory_space<vmem>>, vector<1x1x32xf32>
    %192 = vector.shape_cast %191 : vector<1x1x32xf32> to vector<1x32xf32>
    %c0_125 = arith.constant 0 : index
    %c0_126 = arith.constant 0 : index
    %c0_127 = arith.constant 0 : index
    %193 = vector.load %arg13[%c0_125, %c0_126, %c0_127] : memref<1x1x32xf32, #tpu.memory_space<vmem>>, vector<1x1x32xf32>
    %194 = vector.shape_cast %193 : vector<1x1x32xf32> to vector<1x32xf32>
    %cst_128 = arith.constant dense<0.000000e+00> : vector<10xf32>
    %195 = vector.multi_reduction <add>, %190, %cst_128 [1] : vector<10x32xf32> to vector<10xf32>
    %196 = vector.shape_cast %195 : vector<10xf32> to vector<10x1xf32>
    %cst_129 = arith.constant 3.200000e+01 : f32
    %197 = vector.broadcast %cst_129 : f32 to vector<10x1xf32>
    %198 = arith.divf %196, %197 : vector<10x1xf32>
    %199 = vector.broadcast %198 : vector<10x1xf32> to vector<10x32xf32>
    %200 = arith.subf %190, %199 : vector<10x32xf32>
    %201 = arith.mulf %200, %200 : vector<10x32xf32>
    %cst_130 = arith.constant dense<0.000000e+00> : vector<10xf32>
    %202 = vector.multi_reduction <add>, %201, %cst_130 [1] : vector<10x32xf32> to vector<10xf32>
    %203 = vector.shape_cast %202 : vector<10xf32> to vector<10x1xf32>
    %cst_131 = arith.constant 3.200000e+01 : f32
    %204 = vector.broadcast %cst_131 : f32 to vector<10x1xf32>
    %205 = arith.divf %203, %204 : vector<10x1xf32>
    %206 = vector.broadcast %198 : vector<10x1xf32> to vector<10x32xf32>
    %207 = arith.subf %190, %206 : vector<10x32xf32>
    %cst_132 = arith.constant 9.99999997E-7 : f32
    %208 = vector.broadcast %cst_132 : f32 to vector<10x1xf32>
    %209 = arith.addf %205, %208 : vector<10x1xf32>
    %210 = math.rsqrt %209 : vector<10x1xf32>
    %211 = vector.broadcast %210 : vector<10x1xf32> to vector<10x32xf32>
    %212 = arith.mulf %207, %211 : vector<10x32xf32>
    %213 = vector.broadcast %192 : vector<1x32xf32> to vector<10x32xf32>
    %214 = arith.mulf %212, %213 : vector<10x32xf32>
    %215 = vector.broadcast %194 : vector<1x32xf32> to vector<10x32xf32>
    %216 = arith.addf %214, %215 : vector<10x32xf32>
    %c0_133 = arith.constant 0 : index
    %c0_134 = arith.constant 0 : index
    %c0_135 = arith.constant 0 : index
    %217 = vector.load %arg14[%c0_133, %c0_134, %c0_135] : memref<1x32x64xf32, #tpu.memory_space<vmem>>, vector<1x32x64xf32>
    %218 = vector.shape_cast %217 : vector<1x32x64xf32> to vector<32x64xf32>
    %cst_136 = arith.constant dense<0.000000e+00> : vector<10x64xf32>
    %219 = tpu.matmul %216, %218, %cst_136 {dimension_numbers = #tpu.dot_dimension_numbers<[1], [0], [0], [1], [0, 0, 1, 1], [], []>} : vector<10x32xf32>, vector<32x64xf32>, vector<10x64xf32> -> vector<10x64xf32>
    %c0_137 = arith.constant 0 : index
    %c0_138 = arith.constant 0 : index
    %c0_139 = arith.constant 0 : index
    %220 = vector.load %arg15[%c0_137, %c0_138, %c0_139] : memref<1x1x64xf32, #tpu.memory_space<vmem>>, vector<1x1x64xf32>
    %221 = vector.shape_cast %220 : vector<1x1x64xf32> to vector<1x64xf32>
    %222 = vector.broadcast %221 : vector<1x64xf32> to vector<10x64xf32>
    %223 = arith.addf %219, %222 : vector<10x64xf32>
    %cst_140 = arith.constant 5.000000e-01 : f32
    %224 = vector.broadcast %cst_140 : f32 to vector<10x64xf32>
    %225 = arith.mulf %224, %223 : vector<10x64xf32>
    %cst_141 = arith.constant 0.707106769 : f32
    %226 = vector.broadcast %cst_141 : f32 to vector<10x64xf32>
    %227 = arith.mulf %223, %226 : vector<10x64xf32>
    %228 = math.erf %227 : vector<10x64xf32>
    %cst_142 = arith.constant 1.000000e+00 : f32
    %229 = vector.broadcast %cst_142 : f32 to vector<10x64xf32>
    %230 = arith.addf %229, %228 : vector<10x64xf32>
    %231 = arith.mulf %225, %230 : vector<10x64xf32>
    %c0_143 = arith.constant 0 : index
    %c0_144 = arith.constant 0 : index
    %c0_145 = arith.constant 0 : index
    %232 = vector.load %arg16[%c0_143, %c0_144, %c0_145] : memref<1x64x32xf32, #tpu.memory_space<vmem>>, vector<1x64x32xf32>
    %233 = vector.shape_cast %232 : vector<1x64x32xf32> to vector<64x32xf32>
    %cst_146 = arith.constant dense<0.000000e+00> : vector<10x32xf32>
    %234 = tpu.matmul %231, %233, %cst_146 {dimension_numbers = #tpu.dot_dimension_numbers<[1], [0], [0], [1], [0, 0, 1, 1], [], []>} : vector<10x64xf32>, vector<64x32xf32>, vector<10x32xf32> -> vector<10x32xf32>
    %c0_147 = arith.constant 0 : index
    %c0_148 = arith.constant 0 : index
    %c0_149 = arith.constant 0 : index
    %235 = vector.load %arg17[%c0_147, %c0_148, %c0_149] : memref<1x1x32xf32, #tpu.memory_space<vmem>>, vector<1x1x32xf32>
    %236 = vector.shape_cast %235 : vector<1x1x32xf32> to vector<1x32xf32>
    %237 = vector.broadcast %236 : vector<1x32xf32> to vector<10x32xf32>
    %238 = arith.addf %234, %237 : vector<10x32xf32>
    %239 = arith.addf %190, %238 : vector<10x32xf32>
    %c0_150 = arith.constant 0 : index
    %c0_151 = arith.constant 0 : index
    %240 = vector.load %arg23[%c0_150, %c0_151] : memref<10x32xf32, #tpu.memory_space<vmem>>, vector<10x32xf32>
    tpu.vector_store %arg23[%c0_150, %c0_151], %239 {strides = array<i32>} : memref<10x32xf32, #tpu.memory_space<vmem>>, vector<10x32xf32>,
    %c1_i32 = arith.constant 1 : i32
    %241 = arith.cmpi eq, %arg0, %c1_i32 : i32
    %242 = arith.extui %241 : i1 to i32
    %c0_i32_152 = arith.constant 0 : i32
    %243 = arith.cmpi ne, %242, %c0_i32_152 : i32
    scf.if %243 {
      %c0_153 = arith.constant 0 : index
      %c0_154 = arith.constant 0 : index
      %244 = vector.load %arg18[%c0_153, %c0_154] : memref<1x32xf32, #tpu.memory_space<vmem>>, vector<1x32xf32>
      %c0_155 = arith.constant 0 : index
      %c0_156 = arith.constant 0 : index
      %245 = vector.load %arg19[%c0_155, %c0_156] : memref<1x32xf32, #tpu.memory_space<vmem>>, vector<1x32xf32>
      %cst_157 = arith.constant dense<0.000000e+00> : vector<10xf32>
      %246 = vector.multi_reduction <add>, %239, %cst_157 [1] : vector<10x32xf32> to vector<10xf32>
      %247 = vector.shape_cast %246 : vector<10xf32> to vector<10x1xf32>
      %cst_158 = arith.constant 3.200000e+01 : f32
      %248 = vector.broadcast %cst_158 : f32 to vector<10x1xf32>
      %249 = arith.divf %247, %248 : vector<10x1xf32>
      %250 = vector.broadcast %249 : vector<10x1xf32> to vector<10x32xf32>
      %251 = arith.subf %239, %250 : vector<10x32xf32>
      %252 = arith.mulf %251, %251 : vector<10x32xf32>
      %cst_159 = arith.constant dense<0.000000e+00> : vector<10xf32>
      %253 = vector.multi_reduction <add>, %252, %cst_159 [1] : vector<10x32xf32> to vector<10xf32>
      %254 = vector.shape_cast %253 : vector<10xf32> to vector<10x1xf32>
      %cst_160 = arith.constant 3.200000e+01 : f32
      %255 = vector.broadcast %cst_160 : f32 to vector<10x1xf32>
      %256 = arith.divf %254, %255 : vector<10x1xf32>
      %257 = vector.broadcast %249 : vector<10x1xf32> to vector<10x32xf32>
      %258 = arith.subf %239, %257 : vector<10x32xf32>
      %cst_161 = arith.constant 9.99999997E-7 : f32
      %259 = vector.broadcast %cst_161 : f32 to vector<10x1xf32>
      %260 = arith.addf %256, %259 : vector<10x1xf32>
      %261 = math.rsqrt %260 : vector<10x1xf32>
      %262 = vector.broadcast %261 : vector<10x1xf32> to vector<10x32xf32>
      %263 = arith.mulf %258, %262 : vector<10x32xf32>
      %264 = vector.broadcast %244 : vector<1x32xf32> to vector<10x32xf32>
      %265 = arith.mulf %263, %264 : vector<10x32xf32>
      %266 = vector.broadcast %245 : vector<1x32xf32> to vector<10x32xf32>
      %267 = arith.addf %265, %266 : vector<10x32xf32>
      %c0_162 = arith.constant 0 : index
      %c0_163 = arith.constant 0 : index
      %268 = vector.load %arg20[%c0_162, %c0_163] : memref<32x128xf32, #tpu.memory_space<vmem>>, vector<32x128xf32>
      %cst_164 = arith.constant dense<0.000000e+00> : vector<10x128xf32>
      %269 = tpu.matmul %267, %268, %cst_164 {dimension_numbers = #tpu.dot_dimension_numbers<[1], [0], [0], [1], [0, 0, 1, 1], [], []>} : vector<10x32xf32>, vector<32x128xf32>, vector<10x128xf32> -> vector<10x128xf32>
      %c0_165 = arith.constant 0 : index
      %c0_166 = arith.constant 0 : index
      %270 = vector.load %arg21[%c0_165, %c0_166] : memref<1x128xf32, #tpu.memory_space<vmem>>, vector<1x128xf32>
      %271 = vector.broadcast %270 : vector<1x128xf32> to vector<10x128xf32>
      %272 = arith.addf %269, %271 : vector<10x128xf32>
      %c0_167 = arith.constant 0 : index
      %c0_168 = arith.constant 0 : index
      %273 = vector.load %arg22[%c0_167, %c0_168] : memref<10x128xf32, #tpu.memory_space<vmem>>, vector<10x128xf32>
      tpu.vector_store %arg22[%c0_167, %c0_168], %272 {strides = array<i32>} : memref<10x128xf32, #tpu.memory_space<vmem>>, vector<10x128xf32>,
    } else {
    }
    return
  }
  func.func @transform_0(%arg0: i32) -> (i32, i32) {
    %c0_i32 = arith.constant 0 : i32
    %c0_i32_0 = arith.constant 0 : i32
    %c0_i32_1 = arith.constant 0 : i32
    return %c0_i32, %c0_i32_0 : i32, i32
  }
  func.func @transform_1(%arg0: i32) -> (i32, i32) {
    %c0_i32 = arith.constant 0 : i32
    %c0_i32_0 = arith.constant 0 : i32
    %c0_i32_1 = arith.constant 0 : i32
    return %c0_i32, %c0_i32_0 : i32, i32
  }
  func.func @transform_2(%arg0: i32) -> (i32, i32) {
    %c0_i32 = arith.constant 0 : i32
    %c0_i32_0 = arith.constant 0 : i32
    %c0_i32_1 = arith.constant 0 : i32
    return %c0_i32, %c0_i32_0 : i32, i32
  }
  func.func @transform_3(%arg0: i32) -> (i32, i32) {
    %c0_i32 = arith.constant 0 : i32
    %c0_i32_0 = arith.constant 0 : i32
    %c0_i32_1 = arith.constant 0 : i32
    return %c0_i32, %c0_i32_0 : i32, i32
  }
  func.func @transform_4(%arg0: i32) -> (i32, i32) {
    %c0_i32 = arith.constant 0 : i32
    %c0_i32_0 = arith.constant 0 : i32
    %c0_i32_1 = arith.constant 0 : i32
    return %c0_i32, %c0_i32_0 : i32, i32
  }
  func.func @transform_5(%arg0: i32) -> (i32, i32, i32) {
    %c0_i32 = arith.constant 0 : i32
    %c0_i32_0 = arith.constant 0 : i32
    %c0_i32_1 = arith.constant 0 : i32
    return %arg0, %c0_i32, %c0_i32_0 : i32, i32, i32
  }
  func.func @transform_6(%arg0: i32) -> (i32, i32, i32) {
    %c0_i32 = arith.constant 0 : i32
    %c0_i32_0 = arith.constant 0 : i32
    %c0_i32_1 = arith.constant 0 : i32
    return %arg0, %c0_i32, %c0_i32_0 : i32, i32, i32
  }
  func.func @transform_7(%arg0: i32) -> (i32, i32, i32) {
    %c0_i32 = arith.constant 0 : i32
    %c0_i32_0 = arith.constant 0 : i32
    %c0_i32_1 = arith.constant 0 : i32
    return %arg0, %c0_i32, %c0_i32_0 : i32, i32, i32
  }
  func.func @transform_8(%arg0: i32) -> (i32, i32, i32) {
    %c0_i32 = arith.constant 0 : i32
    %c0_i32_0 = arith.constant 0 : i32
    %c0_i32_1 = arith.constant 0 : i32
    return %arg0, %c0_i32, %c0_i32_0 : i32, i32, i32
  }
  func.func @transform_9(%arg0: i32) -> (i32, i32, i32) {
    %c0_i32 = arith.constant 0 : i32
    %c0_i32_0 = arith.constant 0 : i32
    %c0_i32_1 = arith.constant 0 : i32
    return %arg0, %c0_i32, %c0_i32_0 : i32, i32, i32
  }
  func.func @transform_10(%arg0: i32) -> (i32, i32, i32) {
    %c0_i32 = arith.constant 0 : i32
    %c0_i32_0 = arith.constant 0 : i32
    %c0_i32_1 = arith.constant 0 : i32
    return %arg0, %c0_i32, %c0_i32_0 : i32, i32, i32
  }
  func.func @transform_11(%arg0: i32) -> (i32, i32, i32) {
    %c0_i32 = arith.constant 0 : i32
    %c0_i32_0 = arith.constant 0 : i32
    %c0_i32_1 = arith.constant 0 : i32
    return %arg0, %c0_i32, %c0_i32_0 : i32, i32, i32
  }
  func.func @transform_12(%arg0: i32) -> (i32, i32, i32) {
    %c0_i32 = arith.constant 0 : i32
    %c0_i32_0 = arith.constant 0 : i32
    %c0_i32_1 = arith.constant 0 : i32
    return %arg0, %c0_i32, %c0_i32_0 : i32, i32, i32
  }
  func.func @transform_13(%arg0: i32) -> (i32, i32, i32) {
    %c0_i32 = arith.constant 0 : i32
    %c0_i32_0 = arith.constant 0 : i32
    %c0_i32_1 = arith.constant 0 : i32
    return %arg0, %c0_i32, %c0_i32_0 : i32, i32, i32
  }
  func.func @transform_14(%arg0: i32) -> (i32, i32, i32) {
    %c0_i32 = arith.constant 0 : i32
    %c0_i32_0 = arith.constant 0 : i32
    %c0_i32_1 = arith.constant 0 : i32
    return %arg0, %c0_i32, %c0_i32_0 : i32, i32, i32
  }
  func.func @transform_15(%arg0: i32) -> (i32, i32, i32) {
    %c0_i32 = arith.constant 0 : i32
    %c0_i32_0 = arith.constant 0 : i32
    %c0_i32_1 = arith.constant 0 : i32
    return %arg0, %c0_i32, %c0_i32_0 : i32, i32, i32
  }
  func.func @transform_16(%arg0: i32) -> (i32, i32, i32) {
    %c0_i32 = arith.constant 0 : i32
    %c0_i32_0 = arith.constant 0 : i32
    %c0_i32_1 = arith.constant 0 : i32
    return %arg0, %c0_i32, %c0_i32_0 : i32, i32, i32
  }
  func.func @transform_17(%arg0: i32) -> (i32, i32) {
    %c0_i32 = arith.constant 0 : i32
    %c0_i32_0 = arith.constant 0 : i32
    %c0_i32_1 = arith.constant 0 : i32
    return %c0_i32, %c0_i32_0 : i32, i32
  }
  func.func @transform_18(%arg0: i32) -> (i32, i32) {
    %c0_i32 = arith.constant 0 : i32
    %c0_i32_0 = arith.constant 0 : i32
    %c0_i32_1 = arith.constant 0 : i32
    return %c0_i32, %c0_i32_0 : i32, i32
  }
  func.func @transform_19(%arg0: i32) -> (i32, i32) {
    %c0_i32 = arith.constant 0 : i32
    %c0_i32_0 = arith.constant 0 : i32
    %c0_i32_1 = arith.constant 0 : i32
    return %c0_i32, %c0_i32_0 : i32, i32
  }
  func.func @transform_20(%arg0: i32) -> (i32, i32) {
    %c0_i32 = arith.constant 0 : i32
    %c0_i32_0 = arith.constant 0 : i32
    %c0_i32_1 = arith.constant 0 : i32
    return %c0_i32, %c0_i32_0 : i32, i32
  }
  func.func @transform_21(%arg0: i32) -> (i32, i32) {
    %c0_i32 = arith.constant 0 : i32
    %c0_i32_0 = arith.constant 0 : i32
    %c0_i32_1 = arith.constant 0 : i32
    return %c0_i32, %c0_i32_0 : i32, i32
  }
}

</mosaic_0001>

<bundles_post_ra>
// kernel: vit_forward.1
= control target key start
LH: loop header
LB: loop body
LE: loop exit
PB: predicated region body
PF: predicated region fallthrough
CT: control target
= control target key end

     0   :  { %s4146_s0 = inlined_call_operand.vmem [shape: f32[8,192], index: 0, kind: input, shape index: {}]   ;;  %s4147_s1 = inlined_call_operand.vmem [shape: f32[192,32], index: 1, kind: input, shape index: {}]   ;;  %s4148_s2 = inlined_call_operand.vmem [shape: f32[1,32], index: 2, kind: input, shape index: {}]   ;;  %s4149_s3 = inlined_call_operand.vmem [shape: f32[1,32], index: 3, kind: input, shape index: {}]   ;;  %s4150_s4 = inlined_call_operand.vmem [shape: f32[5,32], index: 4, kind: input, shape index: {}]   ;;  %s4151_s5 = inlined_call_operand.vmem [shape: f32[2,1,32], index: 5, kind: input, shape index: {}]   ;;  %s4152_s6 = inlined_call_operand.vmem [shape: f32[2,1,32], index: 6, kind: input, shape index: {}]   ;;  %s4153_s7 = inlined_call_operand.vmem [shape: f32[2,32,96], index: 7, kind: input, shape index: {}]   ;;  %s4154_s8 = inlined_call_operand.vmem [shape: f32[2,1,96], index: 8, kind: input, shape index: {}]   ;;  %s4155_s9 = inlined_call_operand.vmem [shape: f32[2,32,32], index: 9, kind: input, shape index: {}]   ;;  %s4156_s10 = inlined_call_operand.vmem [shape: f32[2,1,32], index: 10, kind: input, shape index: {}]   ;;  %s4157_s11 = inlined_call_operand.vmem [shape: f32[2,1,32], index: 11, kind: input, shape index: {}]   ;;  %s4158_s12 = inlined_call_operand.vmem [shape: f32[2,1,32], index: 12, kind: input, shape index: {}]   ;;  %s4159_s13 = inlined_call_operand.vmem [shape: f32[2,32,64], index: 13, kind: input, shape index: {}]   ;;  %s4160_s14 = inlined_call_operand.vmem [shape: f32[2,1,64], index: 14, kind: input, shape index: {}]   ;;  %s4161_s15 = inlined_call_operand.vmem [shape: f32[2,64,32], index: 15, kind: input, shape index: {}]   ;;  %s4162_s16 = inlined_call_operand.vmem [shape: f32[2,1,32], index: 16, kind: input, shape index: {}]   ;;  %s4163_s17 = inlined_call_operand.vmem [shape: f32[1,32], index: 17, kind: input, shape index: {}]   ;;  %s4164_s18 = inlined_call_operand.vmem [shape: f32[1,32], index: 18, kind: input, shape index: {}]   ;;  %s4165_s19 = inlined_call_operand.vmem [shape: f32[32,128], index: 19, kind: input, shape index: {}]   ;;  %s4166_s20 = inlined_call_operand.vmem [shape: f32[1,128], index: 20, kind: input, shape index: {}]   ;;  %s4167_s21 = inlined_call_operand.vmem [shape: f32[10,128], index: 21, kind: output, shape index: {}]  }
   0x1   :  { %4174 = sst [smem:[#allocation6_spill]] %s4146_s0 }
   0x2   :  { %4175 = sst [smem:[#allocation7_spill]] %s4147_s1 }
   0x3   :  { %4176 = sst [smem:[#allocation8_spill]] %s4148_s2  ;;  %s3675_s2 = smov 0  }
   0x4   :  { %4177 = sst [smem:[#allocation9_spill]] %s4149_s3 }
   0x5   :  { %4178 = sst [smem:[#allocation10_spill]] %s4150_s4 }
   0x6   :  { %4179 = sst [smem:[#allocation11_spill]] %s4151_s5 }
   0x7   :  { %4180 = sst [smem:[#allocation12_spill]] %s4153_s7 }
   0x8   :  { %4181 = sst [smem:[#allocation13_spill]] %s4155_s9 }
   0x9   :  { %4182 = sst [smem:[#allocation14_spill]] %s4163_s17 }
   0xa   :  { %4183 = sst [smem:[#allocation15_spill]] %s4164_s18 }
   0xb   :  { %4184 = sst [smem:[#allocation16_spill]] %s4166_s20 }
   0xc   :  { %4185 = sst [smem:[#allocation17_spill]] %s4167_s21 }
   0xd LB: > { %4186 = sst [smem:[#allocation5_spill]] %s3546_s2  ;;  %s3681_s25 = sadd.s32 4294967295, %s3546_s2   ;;  %s3546_s2 = sphi %s3675_s2, %s31_s2  }
   0xe   : > { %p3102_p0 = scmp.ge.s32.totalorder %s3546_s2, 1  ;;  %p676_p1 = scmp.lt.s32.totalorder %s3546_s2, 3 }
  0x10   : > { %p677_p2 = pnand %p3102_p0, %p676_p1 }
  0x11   : > { %p770_p3 = scmp.lt.s32.totalorder (!%p677_p2), %s3681_s25, 1  ;;  %s4188_s7 = sld [smem:[#allocation12_spill]] (!%p677_p2) }
  0x12   : > { %680 = sbr.rel (%p677_p2) target bundleno = 3420 (0xd5c), region = 104  ;;  %s4189_s9 = sld [smem:[#allocation13_spill]] (!%p677_p2) }
  0x13   : > { %p3111_p4 = scmp.ne.s32.totalorder (!%p677_p2), %s3681_s25, 0 }
  0x19   : > { %s3687_s26 = scalar_select %p770_p3, %s3681_s25, 1 }
  0x1a   : > { %817 = sbr.rel (%p3111_p4) target bundleno = 300 (0x12c), region = 108  ;;  %s4190_s24 = sld [smem:[#allocation7_spill]] (!%p3111_p4)  ;;  %v3548_v3 = vmov (!%p3111_p4), 0.0|0.0   ;;  %vm851_vm0 = vcmask (!%p3111_p4), 523264   ;;  %vm928_vm1 = vcmask (!%p3111_p4), 253952   ;;  %vm932_vm2 = vcmask (!%p3111_p4), 257024  }
  0x1b   : > { %s3170_s5 = sshll.u32 %s3687_s26, 5  ;;  %s794_s18 = scalar_lea.vmem %s4157_s11, %s3687_s26  ;;  %3383 = vmatprep.subr.bf16.mxu0 (!%p3111_p4), %v3548_v3  ;;  %vm943_vm3 = vcmask (!%p3111_p4), 261124  }
  0x1c   : > { %s3705_s3 = scalar_lea.vmem %s4188_s7, %s3170_s5  ;;  %s3710_s20 = scalar_lea.vmem %s4189_s9, %s3170_s5 }
  0x1d   : > { %s3727_s7 = scalar_lea.vmem %s4159_s13, %s3170_s5  ;;  %s3173_s17 = sshll.u32 %s3687_s26, 6 }
  0x1e   : > { %s3737_s0 = scalar_lea.vmem %s4161_s15, %s3173_s17  ;;  %s4191_s29 = sld [smem:[#allocation6_spill]] (!%p3111_p4) }
  0x1f   : > { %s4192_s27 = sld [smem:[#allocation9_spill]] (!%p3111_p4)  ;;  %s4193_s17 = sld [smem:[#allocation10_spill]] (!%p3111_p4) }
  0x20   : > { %v820_v0 = vld [vmem:[%s4190_s24] sm:$0xff] (!%p3111_p4)  ;;  %v821_v1 = vld [vmem:[%s4190_s24 + $0x8] sm:$0xff] (!%p3111_p4)  ;;  %v822_v2 = vld [vmem:[%s4190_s24 + $0x10] sm:$0xff] (!%p3111_p4)  ;;  %s4194_s21 = sld [smem:[#allocation8_spill]] (!%p3111_p4) }
  0x21   : > { %v3384_v4 = vpack.c.bf16 %v821_v1, %v820_v0  ;;  %v823_v5 = vld [vmem:[%s4190_s24 + $0x18] sm:$0xff]  ;;  %v824_v7 = vld [vmem:[%s4190_s24 + $0x20] sm:$0xff]  ;;  %v825_v8 = vld [vmem:[%s4190_s24 + $0x28] sm:$0xff] }
  0x22   : > { %v3387_v6 = vpack.c.bf16 %v823_v5, %v822_v2  ;;  %v3390_v9 = vpack.c.bf16 %v825_v8, %v824_v7  ;;  %v826_v10 = vld [vmem:[%s4190_s24 + $0x30] sm:$0xff]  ;;  %v827_v11 = vld [vmem:[%s4190_s24 + $0x38] sm:$0xff]  ;;  %v828_v14 = vld [vmem:[%s4190_s24 + $0x40] sm:$0xff] }
  0x23   : > { %3385 = vmatpush1.bf16.msra.mxu0 %v3384_v4  ;;  %v3393_v13 = vpack.c.bf16 %v827_v11, %v826_v10  ;;  %v829_v15 = vld [vmem:[%s4190_s24 + $0x48] sm:$0xff]  ;;  %v830_v17 = vld [vmem:[%s4190_s24 + $0x50] sm:$0xff]  ;;  %v831_v18 = vld [vmem:[%s4190_s24 + $0x58] sm:$0xff] }
  0x24   : > { %3386 = vmatprep.subr.bf16.mxu0 %v3548_v3  ;;  %v819_v12 = vld [vmem:[%s4191_s29 + $0x8] sm:$0xff]  ;;  %v3396_v16 = vpack.c.bf16 %v829_v15, %v828_v14  ;;  %v3399_v19 = vpack.c.bf16 %v831_v18, %v830_v17  ;;  %v832_v20 = vld [vmem:[%s4190_s24 + $0x60] sm:$0xff]  ;;  %v834_v23 = vld [vmem:[%s4190_s24 + $0x70] sm:$0xff] }
  0x25   : > { %3113 = vmatprep.mubr.msk.f32.mxu0 %vm851_vm0, %v819_v12  ;;  %v833_v21 = vld [vmem:[%s4190_s24 + $0x68] sm:$0xff]  ;;  %v835_v24 = vld [vmem:[%s4190_s24 + $0x78] sm:$0xff]  ;;  %v836_v26 = vld [vmem:[%s4190_s24 + $0x80] sm:$0xff] }
  0x26   : > { %v3402_v22 = vpack.c.bf16 %v833_v21, %v832_v20  ;;  %v3405_v25 = vpack.c.bf16 %v835_v24, %v834_v23  ;;  %v837_v27 = vld [vmem:[%s4190_s24 + $0x88] sm:$0xff]  ;;  %v838_v29 = vld [vmem:[%s4190_s24 + $0x90] sm:$0xff]  ;;  %v839_v30 = vld [vmem:[%s4190_s24 + $0x98] sm:$0xff] }
  0x27   : > { %3388 = vmatpush1.bf16.msra.mxu0 %v3387_v6  ;;  %v3408_v28 = vpack.c.bf16 %v837_v27, %v836_v26  ;;  %v3411_v31 = vpack.c.bf16 %v839_v30, %v838_v29  ;;  %v840_v32 = vld [vmem:[%s4190_s24 + $0xa0] sm:$0xff]  ;;  %v841_v33 = vld [vmem:[%s4190_s24 + $0xa8] sm:$0xff]  ;;  %v842_v35 = vld [vmem:[%s4190_s24 + $0xb0] sm:$0xff] }
  0x28   : > { %3389 = vmatprep.subr.bf16.mxu0 %v3548_v3  ;;  %v3414_v34 = vpack.c.bf16 %v841_v33, %v840_v32  ;;  %v843_v36 = vld [vmem:[%s4190_s24 + $0xb8] sm:$0xff]  ;;  %v818_v38 = vld [vmem:[%s4191_s29] sm:$0xff] }
  0x29   : > { %v3417_v37 = vpack.c.bf16 %v843_v36, %v842_v35  ;;  %v925_v39 = vld [vmem:[%s4192_s27] sm:$0x1]  ;;  %v938_v45 = vld [vmem:[%s4193_s17 + $0x1] sm:$0xf] }
  0x2a   : > { %v926_v40 = vld [vmem:[%s4193_s17] sm:$0x1]  ;;  %v940_v47 = vrot.slane %v938_v45, 4  ;;  %v930_v49 = vld [vmem:[%s4193_s17 + $0x1] sm:$0xf] }
  0x2b   : > { %3391 = vmatpush1.bf16.msra.mxu0 %v3390_v9  ;;  %v934_v41 = vld [vmem:[%s4192_s27] sm:$0x1]  ;;  %v927_v42 = vadd.f32 %v926_v40, %v925_v39 }
  0x2c   : > { %3392 = vmatprep.subr.bf16.mxu0 %v3548_v3  ;;  %v935_v43 = vld [vmem:[%s4193_s17] sm:$0x1] }
  0x2d   : > { %v936_v44 = vadd.f32 %v935_v43, %v934_v41  ;;  %929 = vst.msk [vmem:[#allocation2] sm:$0x1] %vm928_vm1, %v927_v42  ;;  %v3112_v46 = vld [vmem:[%s4194_s21] ss:$0 sm:$0xff] }
  0x2f   : > { %3394 = vmatpush1.bf16.msra.mxu0 %v3393_v13  ;;  %937 = vst.msk [vmem:[#allocation2 + $0x5] sm:$0x1] %vm928_vm1, %v936_v44 }
  0x30   : > { %3395 = vmatprep.subr.bf16.mxu0 %v3548_v3 }
  0x33   : > { %3397 = vmatpush1.bf16.msra.mxu0 %v3396_v16 }
  0x34   : > { %3398 = vmatprep.subr.bf16.mxu0 %v3548_v3 }
  0x37   : > { %3400 = vmatpush1.bf16.msra.mxu0 %v3399_v19 }
  0x38   : > { %3401 = vmatprep.subr.bf16.mxu0 %v3548_v3 }
  0x3b   : > { %3403 = vmatpush1.bf16.msra.mxu0 %v3402_v22 }
  0x3c   : > { %3404 = vmatprep.subr.bf16.mxu0 %v3548_v3 }
  0x3f   : > { %3406 = vmatpush1.bf16.msra.mxu0 %v3405_v25 }
  0x40   : > { %3407 = vmatprep.subr.bf16.mxu0 %v3548_v3 }
  0x43   : > { %3409 = vmatpush1.bf16.msra.mxu0 %v3408_v28 }
  0x44   : > { %3410 = vmatprep.subr.bf16.mxu0 %v3548_v3 }
  0x47   : > { %3412 = vmatpush1.bf16.msra.mxu0 %v3411_v31 }
  0x48   : > { %3413 = vmatprep.subr.bf16.mxu0 %v3548_v3 }
  0x4b   : > { %3415 = vmatpush1.bf16.msra.mxu0 %v3414_v34 }
  0x4c   : > { %3416 = vmatprep.subr.bf16.mxu0 %v3548_v3 }
  0x4f   : > { %3418 = vmatpush1.bf16.msra.mxu0 %v3417_v37 }
  0x52   : > { %920 = vmatmul.mubr.f32.vlgmr.msra.gmra.mrb[0].mxu0 %v818_v38 }
 0x125   : > { %v921_v48 = vpop.f32.mrb[0].mxu0 }
 0x126   : > { %v922_v50 = vadd.f32 %v3112_v46, %v921_v48  ;;  %v923_v51 = vpop.f32.mrb[1].mxu0 }
 0x128   : > { %v931_v52 = vadd.f32 %v930_v49, %v922_v50  ;;  %v942_v53 = vadd.f32 %v940_v47, %v922_v50 }
 0x12a   : > { %933 = vst.msk [vmem:[#allocation2 + $0x1] sm:$0xf] %vm932_vm2, %v931_v52 }
 0x12b   : > { %944 = vst.msk [vmem:[#allocation2 + $0x2] sm:$0xf0] %vm943_vm3, %v942_v53 }
 0x12c PF: > { %vm949_vm4 = vcmask 261120   ;;  %vm953_vm5 = vcmask 254976   ;;  %v994_v4 = vld [vmem:[%s3705_s3] sm:$0xff]  ;;  %v995_v5 = vld [vmem:[%s3705_s3 + $0x8] sm:$0xff]  ;;  %v996_v6 = vld [vmem:[%s3705_s3 + $0x10] sm:$0xff]  ;;  %s4195_s30 = sld [smem:[#allocation11_spill]]  ;;  %s4197_s9 = scalar_lea.vmem %s4152_s6, %s3687_s26 }
 0x12d   : > { %v3419_v7 = vpack.c.bf16 %v995_v5, %v994_v4  ;;  %v997_v8 = vld [vmem:[%s3705_s3 + $0x18] sm:$0xff]  ;;  %v3115_v19 = vld [vmem:[%s4197_s9] ss:$0 sm:$0xff]  ;;  %v3549_v26 = vmov 0.0   ;;  %s4198_s22 = scalar_lea.vmem %s4154_s8, %s3687_s26  ;;  %vm1088_vm6 = vcmask 779264   ;;  %vm3550_vm7 = vmmov 0  }
 0x12e   : > { %v3423_v9 = vpack.c.bf16 %v997_v8, %v996_v6  ;;  %3261 = vmatprep.subr.mxu0 %v3549_v26  ;;  %v3116_v27 = vld [vmem:[%s4198_s22] ss:$0 sm:$0xff]  ;;  %3263 = vmatprep.mubr.msk.f32.mxu0 %vm3550_vm7, %v3549_v26  ;;  %vm1086_vm8 = vcmask 785408   ;;  %s3551_s2 = smov 88   ;;  %s3552_s1 = smov 96   ;;  %vm1094_vm9 = vcmask 64512  }
 0x12f   : > { %3420 = vmatprep.subr.bf16.mxu1 %v3419_v7  ;;  %s3553_s28 = smov 120   ;;  %s3556_s4 = smov 104   ;;  %vm1170_vm10 = vcmask 36864   ;;  %vm1188_vm11 = vcmask 1044480   ;;  %vm1184_vm12 = vcmask 39936   ;;  %vm1261_vm13 = vcmask 61440  }
 0x130   : > { %3422 = vmatpush3.bf16.msra.mxu1 %v3419_v7  ;;  %s3557_s23 = smov 72   ;;  %s3558_s9 = smov 64   ;;  %vm1436_vm14 = vcmask 127040   ;;  %vm1611_vm15 = vcmask 192640   ;;  %vm1786_vm0 = vcmask 258240   ;;  %vm2735_vm1 = vcmask 523264  }
 0x131   : > { %3424 = vmatprep.subr.bf16.mxu1 %v3423_v9  ;;  %s3559_s5 = smov 48   ;;  %s3560_s21 = smov 40  }
 0x132   : > { %v3843_v54 = vld [vmem:[#allocation2] sm:$0xff]  ;;  %v3845_v55 = vld [vmem:[#allocation2 + $0x8] sm:$0x3]  ;;  %s4196_s3 = scalar_lea.vmem %s4195_s30, %s3687_s26  ;;  %s3554_s30 = smov 112  }
 0x133   : > { %v950_v56 = vsel %vm949_vm4, %v3843_v54, 0.0  ;;  %v954_v57 = vsel %vm953_vm5, %v3845_v55, 0.0  ;;  %v3114_v17 = vld [vmem:[%s4196_s3] ss:$0 sm:$0xff]  ;;  %s3555_s3 = smov 80   ;;  %s3561_s22 = smov 56  }
 0x134   : > { %951 = vadd.xlane.f32.xlu0 %v950_v56  ;;  %3426 = vmatpush3.bf16.msra.mxu1 %v3423_v9  ;;  %p3162_p5 = scmp.ne.s32.totalorder %s3681_s25, 1 }
 0x135   : > { %3251 = vmatprep.subr.mxu1 %v3549_v26 }
 0x138   : > { %955 = vadd.xlane.f32.xlu0 %v954_v57 }
 0x1c1   : > { %v952_v58 = vpop.xlane.xlu0 %951 }
 0x1c2   : > { %v958_v59 = vmul.f32 0.03125, %v952_v58 }
 0x1c4   : > { %v960_v60 = vsub.f32 %v3843_v54, %v958_v59 }
 0x1c5   : > { %v956_v61 = vpop.xlane.xlu0 %955 }
 0x1c6   : > { %v959_v62 = vmul.f32 0.03125, %v956_v61  ;;  %v962_v63 = vmul.f32 %v960_v60, %v960_v60 }
 0x1c8   : > { %v961_v0 = vsub.f32 %v3845_v55, %v959_v62  ;;  %v964_v1 = vsel %vm949_vm4, %v962_v63, 0.0 }
 0x1c9   : > { %965 = vadd.xlane.f32.xlu1 %v964_v1 }
 0x1ca   : > { %v963_v2 = vmul.f32 %v961_v0, %v961_v0 }
 0x1cc   : > { %v967_v3 = vsel %vm953_vm5, %v963_v2, 0.0 }
 0x1cd   : > { %968 = vadd.xlane.f32.xlu1 %v967_v3 }
 0x256   : > { %v966_v10 = vpop.xlane.xlu1 %965 }
 0x257   : > { %v970_v11 = vmul.f32 0.03125, %v966_v10 }
 0x259   : > { %v972_v12 = vadd.f32 1e-06, %v970_v11 }
 0x25a   : > { %v969_v13 = vpop.xlane.xlu1 %968 }
 0x25b   : > { %3492 = vrsqrt.f32 %v972_v12  ;;  %v971_v14 = vmul.f32 0.03125, %v969_v13 }
 0x25d   : > { %v973_v15 = vadd.f32 1e-06, %v971_v14 }
 0x25f   : > { %3494 = vrsqrt.f32 %v973_v15 }
 0x265   : > { %v3493_v16 = vpop.eup %3492 }
 0x266   : > { %v976_v18 = vmul.f32 %v3493_v16, %v960_v60 }
 0x268   : > { %v984_v20 = vmul.f32 %v3114_v17, %v976_v18 }
 0x269   : > { %v3495_v21 = vpop.eup %3494 }
 0x26a   : > { %v977_v22 = vmul.f32 %v3495_v21, %v961_v0  ;;  %v992_v23 = vadd.f32 %v3115_v19, %v984_v20 }
 0x26c   : > { %v985_v24 = vmul.f32 %v3114_v17, %v977_v22  ;;  %3248 = vmatprep.mubr.msk.f32.mxu1 %vm949_vm4, %v992_v23 }
 0x26e   : > { %v993_v25 = vadd.f32 %v3115_v19, %v985_v24 }
 0x270   : > { %3249 = vmatmul.mubr.msk.f32.vlgmr.msra.gmra.mrb[0].mxu1 %vm949_vm4, %v993_v25 }
 0x271   : > { %3253 = vmatprep.mubr.msk.f32.mxu1 %vm3550_vm7, %v3549_v26 }
 0x343   : > { %v3250_v28 = vpop.f32.mrb[0].mxu1 }
 0x344   : > { %v1083_v29 = vadd.f32 %v3250_v28, %v3116_v27  ;;  %v1077_v30 = vpop.f32.mrb[1].mxu1 }
 0x345   : > { %v1078_v31 = vadd.f32 %v3116_v27, %v1077_v30 }
 0x346   : > { %1089 = vst.msk [vmem:[#allocation3 + $0x8] sm:$0x3] %vm1088_vm6, %v1083_v29 }
 0x347   : > { %1087 = vst.msk [vmem:[#allocation3] sm:$0xff] %vm1086_vm8, %v1078_v31 }
 0x34e   : > { %v3882_v32 = vld [vmem:[#allocation3] sm:$0x1f]  ;;  %v3896_v36 = vld [vmem:[#allocation3 + $0x5] sm:$0x1f] }
 0x34f   : > { %v3884_v33 = vld [vmem:[#allocation3] sm:$0x1f]  ;;  %1267 = vrot.lane.b32.xlu1 %v3882_v32, %s3551_s2  ;;  %v3900_v37 = vld [vmem:[#allocation3 + $0x5] sm:$0x1f] }
 0x350   : > { %1092 = vrot.lane.b32.xlu0 %v3884_v33, %s3552_s1  ;;  %v3888_v34 = vld [vmem:[#allocation3] sm:$0x1f]  ;;  %v3902_v38 = vld [vmem:[#allocation3 + $0x5] sm:$0x1f] }
 0x351   : > { %v3892_v35 = vld [vmem:[#allocation3] sm:$0x1f]  ;;  %v3906_v39 = vld [vmem:[#allocation3 + $0x5] sm:$0x1f] }
 0x353   : > { %1265 = vrot.lane.b32.xlu1 %v3882_v32, %s3553_s28 }
 0x354   : > { %1440 = vrot.lane.b32.xlu0 %v3888_v34, %s3554_s30 }
 0x357   : > { %1442 = vrot.lane.b32.xlu1 %v3888_v34, %s3555_s3 }
 0x358   : > { %1615 = vrot.lane.b32.xlu0 %v3892_v35, %s3556_s4 }
 0x35b   : > { %1617 = vrot.lane.b32.xlu1 %v3892_v35, %s3557_s23 }
 0x35c   : > { %1960 = vrot.lane.b32.xlu0 %v3896_v36, %s3551_s2  ;;  %s3562_s2 = smov 8  }
 0x35f   : > { %1790 = vrot.lane.b32.xlu1 %v3900_v37, %s3552_s1  ;;  %s3563_s1 = smov 16  }
 0x360   : > { %2134 = vrot.lane.b32.xlu0 %v3902_v38, %s3555_s3  ;;  %s4199_s3 = scalar_lea.vmem %s4156_s10, %s3687_s26 }
 0x363   : > { %1958 = vrot.lane.b32.xlu1 %v3896_v36, %s3553_s28  ;;  %s3564_s28 = smov 24  }
 0x364   : > { %2308 = vrot.lane.b32.xlu0 %v3906_v39, %s3557_s23 }
 0x367   : > { %2132 = vrot.lane.b32.xlu1 %v3902_v38, %s3554_s30 }
 0x36b   : > { %2306 = vrot.lane.b32.xlu1 %v3906_v39, %s3556_s4 }
 0x3c1   : > { %v1268_v40 = vpop.permute.xlu1 %1267 }
 0x3c2   : > { %v1093_v41 = vpop.permute.xlu0 %1092  ;;  %3262 = vmatpush3.xpose.msk.msra.mxu0 %vm1094_vm9, %v1268_v40 }
 0x3c3   : > { %3252 = vmatpush3.xpose.msk.msra.mxu1 %vm1094_vm9, %v1093_v41  ;;  %3271 = vmatprep.subr.mxu0 %v3549_v26 }
 0x3c4   : > { %3256 = vmatprep.subr.mxu1 %v3549_v26 }
 0x3c5   : > { %v1266_v42 = vpop.permute.xlu1 %1265 }
 0x3c6   : > { %3254 = vmatmul.mubr.msk.f32.vlgmr.msra.gmra.mrb[2].mxu1 %vm1094_vm9, %v3884_v33  ;;  %v1441_v43 = vpop.permute.xlu0 %1440  ;;  %3264 = vmatmul.mubr.msk.f32.vlgmr.msra.gmra.mrb[0].mxu0 %vm1094_vm9, %v1266_v42 }
 0x3c7   : > { %3258 = vmatprep.mubr.msk.f32.mxu1 %vm3550_vm7, %v3549_v26  ;;  %3273 = vmatprep.mubr.msk.f32.mxu0 %vm3550_vm7, %v3549_v26 }
 0x3c9   : > { %v1443_v44 = vpop.permute.xlu1 %1442 }
 0x3ca   : > { %3272 = vmatpush3.xpose.msk.msra.mxu0 %vm1094_vm9, %v1443_v44  ;;  %v1616_v45 = vpop.permute.xlu0 %1615 }
 0x3cb   : > { %3281 = vmatprep.subr.mxu0 %v3549_v26 }
 0x3cd   : > { %v1618_v46 = vpop.permute.xlu1 %1617  ;;  %3274 = vmatmul.mubr.msk.f32.vlgmr.msra.gmra.mrb[2].mxu0 %vm1094_vm9, %v1441_v43 }
 0x3ce   : > { %3282 = vmatpush3.xpose.msk.msra.mxu0 %vm1094_vm9, %v1618_v46  ;;  %3283 = vmatprep.mubr.msk.f32.mxu0 %vm3550_vm7, %v3549_v26  ;;  %v1961_v47 = vpop.permute.xlu0 %1960 }
 0x3cf   : > { %3291 = vmatprep.subr.mxu0 %v3549_v26 }
 0x3d1   : > { %v1791_v48 = vpop.permute.xlu1 %1790  ;;  %3284 = vmatmul.mubr.msk.f32.vlgmr.msra.gmra.mrb[4].mxu0 %vm1094_vm9, %v1616_v45 }
 0x3d2   : > { %3292 = vmatpush3.xpose.msk.msra.mxu0 %vm1094_vm9, %v1791_v48  ;;  %3293 = vmatprep.mubr.msk.f32.mxu0 %vm3550_vm7, %v3549_v26  ;;  %v2135_v50 = vpop.permute.xlu0 %2134 }
 0x3d3   : > { %3301 = vmatprep.subr.mxu0 %v3549_v26 }
 0x3d5   : > { %v1959_v49 = vpop.permute.xlu1 %1958  ;;  %3294 = vmatmul.mubr.msk.f32.vlgmr.msra.gmra.mrb[6].mxu0 %vm1094_vm9, %v3900_v37 }
 0x3d6   : > { %3302 = vmatpush3.xpose.msk.msra.mxu0 %vm1094_vm9, %v1961_v47  ;;  %3303 = vmatprep.mubr.msk.f32.mxu0 %vm3550_vm7, %v3549_v26  ;;  %v2309_v52 = vpop.permute.xlu0 %2308 }
 0x3d7   : > { %3311 = vmatprep.subr.mxu0 %v3549_v26 }
 0x3d9   : > { %3304 = vmatmul.mubr.msk.f32.vlgmr.msra.gmra.mrb[8].mxu0 %vm1094_vm9, %v1959_v49  ;;  %v2133_v51 = vpop.permute.xlu1 %2132 }
 0x3da   : > { %3312 = vmatpush3.xpose.msk.msra.mxu0 %vm1094_vm9, %v2135_v50  ;;  %3313 = vmatprep.mubr.msk.f32.mxu0 %vm3550_vm7, %v3549_v26 }
 0x3db   : > { %3321 = vmatprep.subr.mxu0 %v3549_v26 }
 0x3dd   : > { %3314 = vmatmul.mubr.msk.f32.vlgmr.msra.gmra.mrb[10].mxu0 %vm1094_vm9, %v2133_v51  ;;  %v2307_v53 = vpop.permute.xlu1 %2306 }
 0x3de   : > { %3322 = vmatpush3.xpose.msk.msra.mxu0 %vm1094_vm9, %v2309_v52  ;;  %3323 = vmatprep.mubr.msk.f32.mxu0 %vm3550_vm7, %v3549_v26 }
 0x3e1   : > { %3324 = vmatmul.mubr.msk.f32.vlgmr.msra.gmra.mrb[12].mxu0 %vm1094_vm9, %v2307_v53 }
 0x499   : > { %v1165_v56 = vpop.f32.mrb[2].mxu1  ;;  %v1339_v59 = vpop.f32.mrb[0].mxu0 }
 0x49a   : > { %v1169_v57 = vmul.f32 0.35355338, %v1165_v56  ;;  %v3255_v58 = vpop.f32.mrb[3].mxu1  ;;  %v1343_v60 = vmul.f32 0.35355338, %v1339_v59  ;;  %v3265_v61 = vpop.f32.mrb[1].mxu0 }
 0x49c   : > { %v1171_v62 = vsel %vm1170_vm10, %v1169_v57, -inf  ;;  %v1344_v63 = vsel %vm1170_vm10, %v1343_v60, -inf }
 0x49d   : > { %1172 = vmax.xlane.f32.xlu0 %v1171_v62  ;;  %1345 = vmax.xlane.f32.xlu1 %v1344_v63 }
 0x4a0   : > { %v1514_v0 = vpop.f32.mrb[2].mxu0 }
 0x4a1   : > { %v3953_v1 = vmul.f32 0.35355338, %v1514_v0  ;;  %v3275_v2 = vpop.f32.mrb[3].mxu0 }
 0x4a3   : > { %v1519_v3 = vsel %vm1170_vm10, %v3953_v1, -inf }
 0x4a4   : > { %1520 = vmax.xlane.f32.xlu0 %v1519_v3  ;;  %v1689_v4 = vpop.f32.mrb[4].mxu0 }
 0x4a5   : > { %v1693_v5 = vmul.f32 0.35355338, %v1689_v4  ;;  %v3285_v6 = vpop.f32.mrb[5].mxu0 }
 0x4a7   : > { %v1694_v7 = vsel %vm1170_vm10, %v1693_v5, -inf }
 0x4a8   : > { %1695 = vmax.xlane.f32.xlu0 %v1694_v7  ;;  %v1862_v8 = vpop.f32.mrb[6].mxu0 }
 0x4a9   : > { %v1866_v9 = vmul.f32 0.35355338, %v1862_v8  ;;  %v3295_v10 = vpop.f32.mrb[7].mxu0 }
 0x4ab   : > { %v1867_v11 = vsel %vm1170_vm10, %v1866_v9, -inf }
 0x4ac   : > { %1868 = vmax.xlane.f32.xlu0 %v1867_v11  ;;  %v2032_v12 = vpop.f32.mrb[8].mxu0 }
 0x4ad   : > { %v2036_v13 = vmul.f32 0.35355338, %v2032_v12  ;;  %v3305_v14 = vpop.f32.mrb[9].mxu0 }
 0x4af   : > { %v2037_v15 = vsel %vm1170_vm10, %v2036_v13, -inf }
 0x4b0   : > { %2038 = vmax.xlane.f32.xlu1 %v2037_v15  ;;  %v2206_v16 = vpop.f32.mrb[10].mxu0 }
 0x4b1   : > { %v2210_v17 = vmul.f32 0.35355338, %v2206_v16  ;;  %v3315_v18 = vpop.f32.mrb[11].mxu0 }
 0x4b3   : > { %v2211_v19 = vsel %vm1170_vm10, %v2210_v17, -inf }
 0x4b4   : > { %2212 = vmax.xlane.f32.xlu0 %v2211_v19  ;;  %v2380_v20 = vpop.f32.mrb[12].mxu0 }
 0x4b5   : > { %v3325_v21 = vpop.f32.mrb[13].mxu0  ;;  %v2384_v22 = vmul.f32 0.35355338, %v2380_v20 }
 0x4b7   : > { %v2385_v23 = vsel %vm1170_vm10, %v2384_v22, -inf }
 0x4c1   : > { %1182 = vrot.lane.b32.xlu1 %v3884_v33, %s3558_s9 }
 0x4e5   : > { %2386 = vmax.xlane.f32.xlu1 %v2385_v23 }
 0x4f6   : > { %1530 = vrot.lane.b32.xlu1 %v3888_v34, %s3559_s5 }
 0x4fa   : > { %1705 = vrot.lane.b32.xlu1 %v3892_v35, %s3560_s21 }
 0x4fe   : > { %1878 = vrot.lane.b32.xlu1 %v3900_v37, %s3558_s9 }
 0x52a   : > { %v1173_v24 = vpop.xlane.xlu0 %1172  ;;  %v1346_v27 = vpop.xlane.xlu1 %1345 }
 0x52b   : > { %v1174_v25 = vsub.f32 %v1169_v57, %v1173_v24  ;;  %v1347_v28 = vsub.f32 %v1343_v60, %v1346_v27 }
 0x52d   : > { %v1175_v29 = vmul.f32 1.442695, %v1174_v25  ;;  %v1348_v30 = vmul.f32 1.442695, %v1347_v28 }
 0x52f   : > { %3496 = vpow2.f32 %v1175_v29 }
 0x530   : > { %3498 = vpow2.f32 %v1348_v30 }
 0x531   : > { %v1521_v31 = vpop.xlane.xlu0 %1520 }
 0x532   : > { %v1522_v47 = vsub.f32 %v3953_v1, %v1521_v31 }
 0x534   : > { %v1523_v49 = vmul.f32 1.442695, %v1522_v47 }
 0x535   : > { %v1696_v33 = vpop.xlane.xlu0 %1695 }
 0x536   : > { %v1697_v40 = vsub.f32 %v1693_v5, %v1696_v33 }
 0x538   : > { %v1698_v34 = vmul.f32 1.442695, %v1697_v40 }
 0x539   : > { %v3968_v41 = vpop.eup %3496  ;;  %v1869_v48 = vpop.xlane.xlu0 %1868 }
 0x53a   : > { %v3970_v42 = vpop.eup %3498  ;;  %v1177_v35 = vsel %vm1170_vm10, %v3968_v41, 0.0  ;;  %3500 = vpow2.f32 %v1698_v34  ;;  %v1870_v50 = vsub.f32 %v1866_v9, %v1869_v48  ;;  %v2480_v48 = vld [vmem:[%s3710_s20] sm:$0xff] }
 0x53b   : > { %1178 = vadd.xlane.f32.xlu0 %v1177_v35  ;;  %v1350_v37 = vsel %vm1170_vm10, %v3970_v42, 0.0  ;;  %3502 = vpow2.f32 %v1523_v49  ;;  %v2481_v49 = vld [vmem:[%s3710_s20 + $0x8] sm:$0xff] }
 0x53c   : > { %1351 = vadd.xlane.f32.xlu1 %v1350_v37  ;;  %v1871_v52 = vmul.f32 1.442695, %v1870_v50  ;;  %v2482_v50 = vld [vmem:[%s3710_s20 + $0x10] sm:$0xff] }
 0x53d   : > { %v2039_v43 = vpop.xlane.xlu1 %2038 }
 0x53e   : > { %3504 = vpow2.f32 %v1871_v52  ;;  %v2040_v56 = vsub.f32 %v2036_v13, %v2039_v43  ;;  %v3427_v52 = vpack.c.bf16 %v2481_v49, %v2480_v48  ;;  %v2722_v49 = vld [vmem:[%s3737_s0 + $0x10] sm:$0xff] }
 0x540   : > { %v2041_v58 = vmul.f32 1.442695, %v2040_v56  ;;  %3428 = vmatprep.subr.bf16.mxu0 %v3427_v52 }
 0x541   : > { %v1183_v44 = vpop.permute.xlu1 %1182  ;;  %v2213_v51 = vpop.xlane.xlu0 %2212  ;;  %3430 = vmatpush3.bf16.msra.mxu0 %v3427_v52  ;;  %v2724_v52 = vld [vmem:[%s3737_s0 + $0x20] sm:$0xff] }
 0x542   : > { %3257 = vmatpush3.msk.msra.mxu1 %vm1188_vm11, %v1183_v44  ;;  %v2214_v53 = vsub.f32 %v2210_v17, %v2213_v51 }
 0x543   : > { %3266 = vmatprep.subr.mxu1 %v3549_v26 }
 0x544   : > { %v3978_v45 = vpop.eup %3500  ;;  %v2215_v57 = vmul.f32 1.442695, %v2214_v53  ;;  %v2483_v53 = vld [vmem:[%s3710_s20 + $0x18] sm:$0xff] }
 0x545   : > { %v1700_v46 = vsel %vm1170_vm10, %v3978_v45, 0.0  ;;  %v3503_v59 = vpop.eup %3502  ;;  %v3431_v56 = vpack.c.bf16 %v2483_v53, %v2482_v50  ;;  %v2723_v50 = vld [vmem:[%s3737_s0 + $0x18] sm:$0xff]  ;;  %v2725_v53 = vld [vmem:[%s3737_s0 + $0x28] sm:$0xff] }
 0x546   : > { %1701 = vadd.xlane.f32.xlu1 %v1700_v46  ;;  %3506 = vpow2.f32 %v2215_v57 }
 0x547   : > { %3508 = vpow2.f32 %v2041_v58  ;;  %3432 = vmatprep.subr.bf16.mxu0 %v3431_v56 }
 0x548   : > { %v3986_v60 = vpop.eup %3504  ;;  %3434 = vmatpush3.bf16.msra.mxu0 %v3431_v56  ;;  %v3451_v56 = vpack.c.bf16 %v2725_v53, %v2724_v52 }
 0x549   : > { %v1873_v61 = vsel %vm1170_vm10, %v3986_v60, 0.0 }
 0x550   : > { %v3990_v62 = vpop.eup %3506 }
 0x551   : > { %1355 = vrot.lane.b32.xlu0 %v3882_v32, %s3561_s22  ;;  %v1525_v32 = vsel %vm1170_vm10, %v3503_v59, 0.0  ;;  %v2217_v1 = vsel %vm1170_vm10, %v3990_v62, 0.0  ;;  %v3509_v2 = vpop.eup %3508 }
 0x552   : > { %v2043_v3 = vsel %vm1170_vm10, %v3509_v2, 0.0 }
 0x557   : > { %2048 = vrot.lane.b32.xlu1 %v3896_v36, %s3561_s22  ;;  %s4201_s22 = scalar_lea.vmem %s4160_s14, %s3687_s26 }
 0x570   : > { %1526 = vadd.xlane.f32.xlu0 %v1525_v32 }
 0x572   : > { %v2387_v36 = vpop.xlane.xlu1 %2386 }
 0x573   : > { %v2388_v63 = vsub.f32 %v2384_v22, %v2387_v36 }
 0x574   : > { %1874 = vadd.xlane.f32.xlu0 %v1873_v61 }
 0x575   : > { %v2389_v0 = vmul.f32 1.442695, %v2388_v63 }
 0x576   : > { %v1531_v6 = vpop.permute.xlu1 %1530 }
 0x577   : > { %3510 = vpow2.f32 %v2389_v0 }
 0x578   : > { %2218 = vadd.xlane.f32.xlu0 %v2217_v1 }
 0x57a   : > { %v1706_v7 = vpop.permute.xlu1 %1705 }
 0x57b   : > { %2044 = vadd.xlane.f32.xlu1 %v2043_v3 }
 0x57e   : > { %v1879_v8 = vpop.permute.xlu1 %1878 }
 0x581   : > { %v3995_v4 = vpop.eup %3510 }
 0x582   : > { %v2391_v5 = vsel %vm1170_vm10, %v3995_v4, 0.0 }
 0x583   : > { %2392 = vadd.xlane.f32.xlu0 %v2391_v5  ;;  %v3151_v5 = vld [vmem:[%s4199_s3] ss:$0 sm:$0xff] }
 0x58c   : > { %2396 = vrot.lane.b32.xlu1 %v3906_v39, %s3560_s21 }
 0x599   : > { %2222 = vrot.lane.b32.xlu0 %v3902_v38, %s3559_s5  ;;  %s4200_s5 = scalar_lea.vmem %s4158_s12, %s3687_s26 }
 0x5c8   : > { %v1179_v9 = vpop.xlane.xlu0 %1178 }
 0x5c9   : > { %3512 = vrcp.f32 %v1179_v9  ;;  %v1352_v10 = vpop.xlane.xlu1 %1351 }
 0x5ca   : > { %3514 = vrcp.f32 %v1352_v10 }
 0x5cc   : > { %v1356_v14 = vpop.permute.xlu0 %1355 }
 0x5d3   : > { %v3513_v11 = vpop.eup %3512  ;;  %v1702_v39 = vpop.xlane.xlu1 %1701 }
 0x5d4   : > { %v1181_v12 = vmul.f32 %v3513_v11, %v3968_v41  ;;  %v3515_v13 = vpop.eup %3514 }
 0x5d5   : > { %v1354_v38 = vmul.f32 %v3515_v13, %v3970_v42 }
 0x5d6   : > { %3259 = vmatmul.mubr.msk.f32.vlgmr.msra.gmra.mrb[4].mxu1 %vm1184_vm12, %v1181_v12 }
 0x5d7   : > { %3267 = vmatpush3.msk.msra.mxu1 %vm1188_vm11, %v1356_v14  ;;  %3268 = vmatprep.mubr.msk.f32.mxu1 %vm3550_vm7, %v3549_v26  ;;  %v2049_v17 = vpop.permute.xlu1 %2048 }
 0x5d8   : > { %3276 = vmatprep.subr.mxu1 %v3549_v26 }
 0x5da   : > { %3269 = vmatmul.mubr.msk.f32.vlgmr.msra.gmra.mrb[6].mxu1 %vm1184_vm12, %v1354_v38 }
 0x5db   : > { %3277 = vmatpush3.msk.msra.mxu1 %vm1188_vm11, %v1531_v6  ;;  %3278 = vmatprep.mubr.msk.f32.mxu1 %vm3550_vm7, %v3549_v26 }
 0x5dc   : > { %3286 = vmatprep.subr.mxu1 %v3549_v26 }
 0x5fd   : > { %v1527_v15 = vpop.xlane.xlu0 %1526 }
 0x5fe   : > { %3516 = vrcp.f32 %v1527_v15 }
 0x5ff   : > { %3518 = vrcp.f32 %v1702_v39 }
 0x601   : > { %v1875_v16 = vpop.xlane.xlu0 %1874 }
 0x602   : > { %3520 = vrcp.f32 %v1875_v16 }
 0x605   : > { %v2219_v20 = vpop.xlane.xlu0 %2218 }
 0x608   : > { %v3517_v18 = vpop.eup %3516  ;;  %v2045_v21 = vpop.xlane.xlu1 %2044 }
 0x609   : > { %v1529_v19 = vmul.f32 %v3517_v18, %v3503_v59  ;;  %v3519_v22 = vpop.eup %3518  ;;  %3522 = vrcp.f32 %v2045_v21  ;;  %v2619_v21 = vld [vmem:[%s3727_s7 + $0x8] sm:$0xff] }
 0x60a   : > { %3524 = vrcp.f32 %v2219_v20  ;;  %v1704_v23 = vmul.f32 %v3519_v22, %v3978_v45  ;;  %v2618_v20 = vld [vmem:[%s3727_s7] sm:$0xff] }
 0x60b   : > { %3279 = vmatmul.mubr.msk.f32.vlgmr.msra.gmra.mrb[8].mxu1 %vm1184_vm12, %v1529_v19  ;;  %v3435_v22 = vpack.c.bf16 %v2619_v21, %v2618_v20 }
 0x60c   : > { %3287 = vmatpush3.msk.msra.mxu1 %vm1188_vm11, %v1706_v7  ;;  %3288 = vmatprep.mubr.msk.f32.mxu1 %vm3550_vm7, %v3549_v26  ;;  %v3521_v24 = vpop.eup %3520  ;;  %v2397_v40 = vpop.permute.xlu1 %2396 }
 0x60d   : > { %3296 = vmatprep.subr.mxu1 %v3549_v26  ;;  %v1877_v25 = vmul.f32 %v3521_v24, %v3986_v60  ;;  %v2621_v24 = vld [vmem:[%s3727_s7 + $0x18] sm:$0xff] }
 0x60f   : > { %3289 = vmatmul.mubr.msk.f32.vlgmr.msra.gmra.mrb[10].mxu1 %vm1184_vm12, %v1704_v23  ;;  %v2620_v23 = vld [vmem:[%s3727_s7 + $0x10] sm:$0xff] }
 0x610   : > { %3297 = vmatpush3.msk.msra.mxu1 %vm1188_vm11, %v1879_v8  ;;  %3298 = vmatprep.mubr.msk.f32.mxu1 %vm3550_vm7, %v3549_v26  ;;  %v2393_v27 = vpop.xlane.xlu0 %2392 }
 0x611   : > { %3306 = vmatprep.subr.mxu1 %v3549_v26  ;;  %3526 = vrcp.f32 %v2393_v27 }
 0x613   : > { %3299 = vmatmul.mubr.msk.f32.vlgmr.msra.gmra.mrb[12].mxu1 %vm1184_vm12, %v1877_v25  ;;  %v3523_v28 = vpop.eup %3522  ;;  %v3439_v25 = vpack.c.bf16 %v2621_v24, %v2620_v23  ;;  %v2869_v24 = vld [vmem:[%s4165_s19] sm:$0xff] (!%p3162_p5) }
 0x614   : > { %3307 = vmatpush3.msk.msra.mxu1 %vm1188_vm11, %v2049_v17  ;;  %3308 = vmatprep.mubr.msk.f32.mxu1 %vm3550_vm7, %v3549_v26  ;;  %v2047_v29 = vmul.f32 %v3523_v28, %v3509_v2  ;;  %v2223_v30 = vpop.permute.xlu0 %2222  ;;  %v3525_v31 = vpop.eup %3524 }
 0x615   : > { %3316 = vmatprep.subr.mxu1 %v3549_v26  ;;  %v2221_v33 = vmul.f32 %v3525_v31, %v3990_v62 }
 0x617   : > { %3309 = vmatmul.mubr.msk.f32.vlgmr.msra.gmra.mrb[14].mxu1 %vm1184_vm12, %v2047_v29 }
 0x618   : > { %3317 = vmatpush3.msk.msra.mxu1 %vm1188_vm11, %v2223_v30  ;;  %3318 = vmatprep.mubr.msk.f32.mxu1 %vm3550_vm7, %v3549_v26 }
 0x619   : > { %3326 = vmatprep.subr.mxu1 %v3549_v26 }
 0x61b   : > { %3319 = vmatmul.mubr.msk.f32.vlgmr.msra.gmra.mrb[16].mxu1 %vm1184_vm12, %v2221_v33  ;;  %v3527_v41 = vpop.eup %3526 }
 0x61c   : > { %3327 = vmatpush3.msk.msra.mxu1 %vm1188_vm11, %v2397_v40  ;;  %3328 = vmatprep.mubr.msk.f32.mxu1 %vm3550_vm7, %v3549_v26  ;;  %v2395_v34 = vmul.f32 %v3527_v41, %v3995_v4  ;;  %v3154_v41 = vld [vmem:[%s794_s18] ss:$0 sm:$0xff] }
 0x61d   : > { %3436 = vmatprep.subr.bf16.mxu1 %v3435_v22 }
 0x61f   : > { %3329 = vmatmul.mubr.msk.f32.vlgmr.msra.gmra.mrb[18].mxu1 %vm1184_vm12, %v2395_v34 }
 0x620   : > { %3438 = vmatpush3.bf16.msra.mxu1 %v3435_v22 }
 0x621   : > { %3440 = vmatprep.subr.bf16.mxu1 %v3439_v25 }
 0x624   : > { %3442 = vmatpush3.bf16.msra.mxu1 %v3439_v25  ;;  %v2870_v25 = vld [vmem:[%s4165_s19 + $0x8] sm:$0xff] (!%p3162_p5) }
 0x6a9   : > { %v1257_v42 = vpop.f32.mrb[4].mxu1 }
 0x6aa   : > { %1262 = vst.msk [vmem:[#allocation4] sm:$0x1f] %vm1261_vm13, %v1257_v42  ;;  %v3260_v35 = vpop.f32.mrb[5].mxu1  ;;  %v3155_v42 = vld [vmem:[%s4200_s5] ss:$0 sm:$0xff]  ;;  %s4203_s5 = sld [smem:[#allocation14_spill]] (!%p3162_p5) }
 0x6ad   : > { %v1428_v37 = vpop.f32.mrb[6].mxu1 }
 0x6ae   : > { %1433 = vrot.lane.b32.xlu0 %v1428_v37, %s3562_s2  ;;  %v3270_v43 = vpop.f32.mrb[7].mxu1 }
 0x6de   : > { %v1603_v44 = vpop.f32.mrb[8].mxu1 }
 0x6df   : > { %1608 = vrot.lane.b32.xlu0 %v1603_v44, %s3563_s1  ;;  %v3280_v26 = vpop.f32.mrb[9].mxu1 }
 0x6e2   : > { %v1778_v45 = vpop.f32.mrb[10].mxu1 }
 0x6e3   : > { %1783 = vrot.lane.b32.xlu0 %v1778_v45, %s3564_s28  ;;  %v3290_v46 = vpop.f32.mrb[11].mxu1 }
 0x6e4   : > { %v2720_v46 = vld [vmem:[%s3737_s0] sm:$0xff] }
 0x6e6   : > { %v1951_v47 = vpop.f32.mrb[12].mxu1 }
 0x6e7   : > { %1955 = vst.msk [vmem:[#allocation4 + $0x5] sm:$0x1f] %vm1261_vm13, %v1951_v47  ;;  %v3300_v51 = vpop.f32.mrb[13].mxu1  ;;  %v2721_v47 = vld [vmem:[%s3737_s0 + $0x8] sm:$0xff] }
 0x6e8   : > { %v3443_v48 = vpack.c.bf16 %v2721_v47, %v2720_v46  ;;  %v3447_v51 = vpack.c.bf16 %v2723_v50, %v2722_v49 }
 0x6ea   : > { %v2121_v57 = vpop.f32.mrb[14].mxu1  ;;  %3444 = vmatprep.subr.bf16.mxu0 %v3443_v48 }
 0x6eb   : > { %2126 = vrot.lane.b32.xlu1 %v2121_v57, %s3562_s2  ;;  %v3310_v58 = vpop.f32.mrb[15].mxu1  ;;  %v2726_v57 = vld [vmem:[%s3737_s0 + $0x30] sm:$0xff] }
 0x6ec   : > { %v2727_v58 = vld [vmem:[%s3737_s0 + $0x38] sm:$0xff] }
 0x6ee   : > { %v2295_v59 = vpop.f32.mrb[16].mxu1 }
 0x6ef   : > { %2300 = vrot.lane.b32.xlu1 %v2295_v59, %s3563_s1  ;;  %v3320_v32 = vpop.f32.mrb[17].mxu1  ;;  %v3455_v59 = vpack.c.bf16 %v2727_v58, %v2726_v57  ;;  %s4202_s1 = scalar_lea.vmem %s4162_s16, %s3687_s26 }
 0x6f0   : > { %v3156_v32 = vld [vmem:[%s4201_s22] ss:$0 sm:$0xff]  ;;  %s4204_s22 = sld [smem:[#allocation15_spill]] (!%p3162_p5) }
 0x6f2   : > { %v2469_v60 = vpop.f32.mrb[18].mxu1 }
 0x6f3   : > { %2474 = vrot.lane.b32.xlu1 %v2469_v60, %s3564_s28  ;;  %v3330_v36 = vpop.f32.mrb[19].mxu1  ;;  %s4206_s28 = sld [smem:[#allocation17_spill]] (!%p3162_p5) }
 0x720   : > { %v1434_v61 = vpop.permute.xlu0 %1433 }
 0x721   : > { %1437 = vst.msk [vmem:[#allocation4] sm:$0x1f] %vm1436_vm14, %v1434_v61 }
 0x751   : > { %v1609_v62 = vpop.permute.xlu0 %1608 }
 0x752   : > { %1612 = vst.msk [vmem:[#allocation4] sm:$0x1f] %vm1611_vm15, %v1609_v62 }
 0x755   : > { %v1784_v63 = vpop.permute.xlu0 %1783 }
 0x756   : > { %1787 = vst.msk [vmem:[#allocation4] sm:$0x1f] %vm1786_vm0, %v1784_v63 }
 0x75d   : > { %v2127_v0 = vpop.permute.xlu1 %2126 }
 0x75e   : > { %2129 = vst.msk [vmem:[#allocation4 + $0x5] sm:$0x1f] %vm1436_vm14, %v2127_v0 }
 0x761   : > { %v2301_v1 = vpop.permute.xlu1 %2300 }
 0x762   : > { %2303 = vst.msk [vmem:[#allocation4 + $0x5] sm:$0x1f] %vm1611_vm15, %v2301_v1 }
 0x765   : > { %v2475_v2 = vpop.permute.xlu1 %2474 }
 0x766   : > { %2477 = vst.msk [vmem:[#allocation4 + $0x5] sm:$0x1f] %vm1786_vm0, %v2475_v2 }
 0x76d   : > { %v2478_v3 = vld [vmem:[#allocation4] sm:$0xff]  ;;  %v2479_v4 = vld [vmem:[#allocation4 + $0x8] sm:$0x3] }
 0x76e   : > { %3339 = vmatprep.mubr.msk.f32.mxu0 %vm949_vm4, %v2478_v3 }
 0x76f   : > { %3340 = vmatmul.mubr.msk.f32.vlgmr.msra.gmra.mrb[14].mxu0 %vm949_vm4, %v2479_v4 }
 0x770   : > { %3446 = vmatpush3.bf16.msra.mxu0 %v3443_v48 }
 0x771   : > { %3448 = vmatprep.subr.bf16.mxu0 %v3447_v51 }
 0x774   : > { %3450 = vmatpush3.bf16.msra.mxu0 %v3447_v51 }
 0x775   : > { %3452 = vmatprep.subr.bf16.mxu0 %v3451_v56 }
 0x778   : > { %3454 = vmatpush3.bf16.msra.mxu0 %v3451_v56 }
 0x779   : > { %3456 = vmatprep.subr.bf16.mxu0 %v3455_v59 }
 0x77c   : > { %3458 = vmatpush3.bf16.msra.mxu0 %v3455_v59 }
 0x842   : > { %v3341_v6 = vpop.f32.mrb[14].mxu0 }
 0x843   : > { %v2569_v7 = vadd.f32 %v3341_v6, %v3151_v5  ;;  %v2563_v8 = vpop.f32.mrb[15].mxu0 }
 0x844   : > { %v2564_v9 = vadd.f32 %v3151_v5, %v2563_v8 }
 0x845   : > { %v4058_v10 = vadd.f32 %v2569_v7, %v3845_v55 }
 0x846   : > { %v4061_v11 = vadd.f32 %v2564_v9, %v3843_v54  ;;  %v3159_v9 = vld [vmem:[%s4202_s1] ss:$0 sm:$0xff]  ;;  %s4205_s1 = sld [smem:[#allocation16_spill]] (!%p3162_p5) }
 0x847   : > { %v2579_v12 = vsel %vm953_vm5, %v4058_v10, 0.0 }
 0x848   : > { %2580 = vadd.xlane.f32.xlu1 %v2579_v12  ;;  %v2576_v13 = vsel %vm949_vm4, %v4061_v11, 0.0 }
 0x849   : > { %2577 = vadd.xlane.f32.xlu0 %v2576_v13 }
 0x84c   : > { %v3165_v50 = vld [vmem:[%s4205_s1] ss:$0 sm:$0xff] (!%p3162_p5) }
 0x8d5   : > { %v2581_v14 = vpop.xlane.xlu1 %2580 }
 0x8d6   : > { %v2583_v38 = vmul.f32 0.03125, %v2581_v14  ;;  %v2578_v39 = vpop.xlane.xlu0 %2577 }
 0x8d7   : > { %v2582_v55 = vmul.f32 0.03125, %v2578_v39 }
 0x8d8   : > { %v2585_v15 = vsub.f32 %v4058_v10, %v2583_v38 }
 0x8d9   : > { %v2584_v54 = vsub.f32 %v4061_v11, %v2582_v55 }
 0x8da   : > { %v2587_v18 = vmul.f32 %v2585_v15, %v2585_v15 }
 0x8db   : > { %v2586_v16 = vmul.f32 %v2584_v54, %v2584_v54 }
 0x8dc   : > { %v2591_v19 = vsel %vm953_vm5, %v2587_v18, 0.0 }
 0x8dd   : > { %v2588_v17 = vsel %vm949_vm4, %v2586_v16, 0.0 }
 0x8de   : > { %2589 = vadd.xlane.f32.xlu0 %v2588_v17 }
 0x8e2   : > { %2592 = vadd.xlane.f32.xlu0 %v2591_v19 }
 0x96b   : > { %v2590_v27 = vpop.xlane.xlu0 %2589 }
 0x96c   : > { %v2594_v28 = vmul.f32 0.03125, %v2590_v27  ;;  %v2871_v27 = vld [vmem:[%s4165_s19 + $0x10] sm:$0xff] (!%p3162_p5) }
 0x96e   : > { %v2596_v29 = vadd.f32 1e-06, %v2594_v28  ;;  %v3459_v28 = vpack.c.bf16 (!%p3162_p5), %v2870_v25, %v2869_v24 }
 0x96f   : > { %v2593_v30 = vpop.xlane.xlu0 %2592 }
 0x970   : > { %3528 = vrsqrt.f32 %v2596_v29  ;;  %v2595_v31 = vmul.f32 0.03125, %v2593_v30  ;;  %v2872_v29 = vld [vmem:[%s4165_s19 + $0x18] sm:$0xff] (!%p3162_p5)  ;;  %3460 = vmatprep.subr.bf16.mxu0 (!%p3162_p5), %v3459_v28 }
 0x971   : > { %v3463_v30 = vpack.c.bf16 (!%p3162_p5), %v2872_v29, %v2871_v27 }
 0x972   : > { %v2597_v33 = vadd.f32 1e-06, %v2595_v31 }
 0x974   : > { %3530 = vrsqrt.f32 %v2597_v33 }
 0x97a   : > { %v3529_v40 = vpop.eup %3528 }
 0x97b   : > { %v2600_v34 = vmul.f32 %v3529_v40, %v2584_v54 }
 0x97d   : > { %v2608_v35 = vmul.f32 %v3154_v41, %v2600_v34 }
 0x97e   : > { %v3531_v37 = vpop.eup %3530 }
 0x97f   : > { %v2601_v43 = vmul.f32 %v3531_v37, %v2585_v15  ;;  %v2616_v44 = vadd.f32 %v3155_v42, %v2608_v35  ;;  %v3163_v37 = vld [vmem:[%s4203_s5] ss:$0 sm:$0xff] (!%p3162_p5) }
 0x981   : > { %v2609_v26 = vmul.f32 %v3154_v41, %v2601_v43  ;;  %3350 = vmatprep.mubr.msk.f32.mxu1 %vm949_vm4, %v2616_v44  ;;  %v3164_v44 = vld [vmem:[%s4204_s22] ss:$0 sm:$0xff] (!%p3162_p5) }
 0x983   : > { %v2617_v45 = vadd.f32 %v3155_v42, %v2609_v26 }
 0x985   : > { %3351 = vmatmul.mubr.msk.f32.vlgmr.msra.gmra.mrb[20].mxu1 %vm949_vm4, %v2617_v45 }
 0xa58   : > { %v3352_v60 = vpop.f32.mrb[20].mxu1 }
 0xa59   : > { %v2707_v36 = vadd.f32 %v3352_v60, %v3156_v32  ;;  %v2701_v61 = vpop.f32.mrb[21].mxu1 }
 0xa5a   : > { %v2702_v62 = vadd.f32 %v3156_v32, %v2701_v61 }
 0xa5b   : > { %v2713_v63 = vmul.f32 0.70710677, %v2707_v36  ;;  %v2711_v6 = vmul.f32 0.5, %v2707_v36 }
 0xa5c   : > { %v2712_v0 = vmul.f32 0.70710677, %v2702_v62  ;;  %v2710_v4 = vmul.f32 0.5, %v2702_v62 }
 0xa5d   : > { %3532 = verf.f32 %v2713_v63 }
 0xa5e   : > { %3534 = verf.f32 %v2712_v0 }
 0xa67   : > { %v3533_v1 = vpop.eup %3532 }
 0xa68   : > { %v3535_v2 = vpop.eup %3534  ;;  %v2717_v3 = vadd.f32 1.0, %v3533_v1 }
 0xa69   : > { %v2716_v5 = vadd.f32 1.0, %v3535_v2 }
 0xa6a   : > { %v2719_v8 = vmul.f32 %v2717_v3, %v2711_v6 }
 0xa6b   : > { %v2718_v7 = vmul.f32 %v2716_v5, %v2710_v4 }
 0xa6d   : > { %3369 = vmatprep.mubr.msk.f32.mxu0 %vm2735_vm1, %v2718_v7 }
 0xa6e   : > { %3370 = vmatmul.mubr.msk.f32.vlgmr.msra.gmra.mrb[16].mxu0 %vm2735_vm1, %v2719_v8 }
 0xa6f   : > { %3462 = vmatpush3.bf16.msra.mxu0 (!%p3162_p5), %v3459_v28 }
 0xa70   : > { %3464 = vmatprep.subr.bf16.mxu0 (!%p3162_p5), %v3463_v30 }
 0xa73   : > { %3466 = vmatpush3.bf16.msra.mxu0 (!%p3162_p5), %v3463_v30 }
 0xb41   : > { %v3371_v12 = vpop.f32.mrb[16].mxu0  ;;  %2824 = sbr.rel (%p3162_p5) target bundleno = 3420 (0xd5c), region = 112 }
 0xb42   : > { %v2814_v13 = vadd.f32 %v3371_v12, %v3159_v9  ;;  %v2808_v14 = vpop.f32.mrb[17].mxu0 }
 0xb43   : > { %v2809_v38 = vadd.f32 %v3159_v9, %v2808_v14 }
 0xb44   : > { %v2818_v39 = vadd.f32 %v2814_v13, %v4058_v10 }
 0xb45   : > { %v2817_v55 = vadd.f32 %v2809_v38, %v4061_v11 }
 0xb46   : > { %2820 = vst.msk [vmem:[#allocation2 + $0x8] sm:$0x3] %vm953_vm5, %v2818_v39  ;;  %v2830_v54 = vsel (!%p3162_p5), %vm953_vm5, %v2818_v39, 0.0 }
 0xb47   : > { %2819 = vst.msk [vmem:[#allocation2] sm:$0xff] %vm949_vm4, %v2817_v55  ;;  %v2827_v15 = vsel (!%p3162_p5), %vm949_vm4, %v2817_v55, 0.0 }
 0xb48   : > { %2828 = vadd.xlane.f32.xlu0 %v2827_v15 }
 0xb4c   : > { %2831 = vadd.xlane.f32.xlu0 %v2830_v54 }
 0xbd5   : > { %v2829_v16 = vpop.xlane.xlu0 %2828 }
 0xbd6   : > { %v2833_v17 = vmul.f32 0.03125, %v2829_v16 }
 0xbd8   : > { %v2835_v18 = vsub.f32 %v2817_v55, %v2833_v17 }
 0xbd9   : > { %v2832_v19 = vpop.xlane.xlu0 %2831 }
 0xbda   : > { %v2834_v10 = vmul.f32 0.03125, %v2832_v19  ;;  %v2837_v20 = vmul.f32 %v2835_v18, %v2835_v18 }
 0xbdc   : > { %v2836_v11 = vsub.f32 %v2818_v39, %v2834_v10  ;;  %v2839_v21 = vsel %vm949_vm4, %v2837_v20, 0.0 }
 0xbdd   : > { %2840 = vadd.xlane.f32.xlu1 %v2839_v21 }
 0xbde   : > { %v2838_v22 = vmul.f32 %v2836_v11, %v2836_v11 }
 0xbe0   : > { %v2842_v23 = vsel %vm953_vm5, %v2838_v22, 0.0 }
 0xbe1   : > { %2843 = vadd.xlane.f32.xlu1 %v2842_v23 }
 0xc6a   : > { %v2841_v31 = vpop.xlane.xlu1 %2840 }
 0xc6b   : > { %v2845_v33 = vmul.f32 0.03125, %v2841_v31 }
 0xc6d   : > { %v2847_v40 = vadd.f32 1e-06, %v2845_v33 }
 0xc6e   : > { %v2844_v41 = vpop.xlane.xlu1 %2843 }
 0xc6f   : > { %3536 = vrsqrt.f32 %v2847_v40  ;;  %v2846_v34 = vmul.f32 0.03125, %v2844_v41 }
 0xc71   : > { %v2848_v42 = vadd.f32 1e-06, %v2846_v34 }
 0xc73   : > { %3538 = vrsqrt.f32 %v2848_v42 }
 0xc79   : > { %v3537_v35 = vpop.eup %3536 }
 0xc7a   : > { %v2851_v43 = vmul.f32 %v3537_v35, %v2835_v18 }
 0xc7c   : > { %v2859_v26 = vmul.f32 %v3163_v37, %v2851_v43 }
 0xc7d   : > { %v3539_v45 = vpop.eup %3538 }
 0xc7e   : > { %v2852_v46 = vmul.f32 %v3539_v45, %v2836_v11  ;;  %v2867_v47 = vadd.f32 %v3164_v44, %v2859_v26 }
 0xc80   : > { %v2860_v48 = vmul.f32 %v3163_v37, %v2852_v46  ;;  %3380 = vmatprep.mubr.msk.f32.mxu0 %vm949_vm4, %v2867_v47 }
 0xc82   : > { %v2868_v49 = vadd.f32 %v3164_v44, %v2860_v48 }
 0xc84   : > { %3381 = vmatmul.mubr.msk.f32.vlgmr.msra.gmra.mrb[0].mxu0 %vm949_vm4, %v2868_v49 }
 0xd57   : > { %v3382_v51 = vpop.f32.mrb[0].mxu0 }
 0xd58   : > { %v2958_v52 = vadd.f32 %v3382_v51, %v3165_v50  ;;  %v2952_v53 = vpop.f32.mrb[1].mxu0 }
 0xd59   : > { %v2953_v56 = vadd.f32 %v3165_v50, %v2952_v53 }
 0xd5a   : > { %2962 = vst [vmem:[%s4206_s28 + $0x8] sm:$0x3] %v2958_v52 }
 0xd5b   : > { %2961 = vst [vmem:[%s4206_s28] sm:$0xff] %v2953_v56 }
 0xd5c PF: > { %s4207_s3 = sld [smem:[#allocation5_spill]] }
 0xd62   : > { %s31_s2 = sadd.s32 1, %s4207_s3  }
 0xd63   : > { %p28_p6 = scmp.ge.s32.totalorder %s31_s2, 4  }
 0xd65   :  { %30 = sbr.rel (!%p28_p6) target bundleno = 13 (0xd), region = 171 }

</bundles_post_ra>
